<compile_context>
chip_gen: v5e
topology: v5e:2x2
jax: 0.10.0
libtpu: 0.0.40
codegen_flags: <defaults>
</compile_context>

<pallas_src>
from functools import partial

import numpy as np
import jax
import jax.numpy as jnp
from jax import lax
from jax.experimental import pallas as pl
from jax.experimental.pallas import tpu as pltpu

# Tiles below are sized to stay far under this; 48 MiB leaves headroom on
# v7x (64 MiB physical VMEM per TensorCore); v5e/v6e have 128 MiB.
_VMEM_LIMIT_BYTES = 48 * 1024 * 1024


def _pick_block(total, target, align):
    """Largest multiple of `align` that divides `total` and is <= target.
    Falls back to `total` (a full-extent block is always a legal block dim)."""
    if total <= target:
        return total
    t = (min(target, total) // align) * align
    while t >= align:
        if total % t == 0:
            return t
        t -= align
    return total


def _pick_head_group(num_heads, head_dim):
    """Smallest head group whose channel slab (Hb*D) is a multiple of 128 lanes
    (lane-dense output stores, MXU-friendly); fall back to all heads
    (slab == C, which is always a legal block width)."""
    for hb in range(1, num_heads + 1):
        if num_heads % hb == 0 and (hb * head_dim) % 128 == 0:
            return hb
    return num_heads


# ---------------------------------------------------------------------------
# Tiled linear projections.  Weights are pre-transposed to (Cin, Cout) once,
# outside the hot path.  Bias is optional (q/k/v projections have none).
# ---------------------------------------------------------------------------
def _linear_kernel(x_ref, w_ref, o_ref):
    o_ref[...] = jnp.dot(
        x_ref[...], w_ref[...], preferred_element_type=jnp.float32
    ).astype(o_ref.dtype)


def _linear_bias_kernel(x_ref, w_ref, b_ref, o_ref):
    acc = jnp.dot(x_ref[...], w_ref[...], preferred_element_type=jnp.float32)
    o_ref[...] = (acc + b_ref[...]).astype(o_ref.dtype)


def _tiled_linear(x2d, w_t, bias=None, *, block_rows=512, block_cols=512):
    """x2d: (R, Cin); w_t: (Cin, Cout) pre-transposed; bias: (1, Cout) or None."""
    R, Cin = x2d.shape
    Cout = w_t.shape[1]
    bm = _pick_block(R, block_rows, 8)
    bn = _pick_block(Cout, block_cols, 128)
    grid = (R // bm, Cout // bn)

    in_specs = [
        pl.BlockSpec((bm, Cin), lambda i, j: (i, 0)),
        pl.BlockSpec((Cin, bn), lambda i, j: (0, j)),
    ]
    args = [x2d, w_t]
    kernel = _linear_kernel
    if bias is not None:
        in_specs.append(pl.BlockSpec((1, bn), lambda i, j: (0, j)))
        args.append(bias)
        kernel = _linear_bias_kernel

    return pl.pallas_call(
        kernel,
        out_shape=jax.ShapeDtypeStruct((R, Cout), x2d.dtype),
        grid=grid,
        in_specs=in_specs,
        out_specs=pl.BlockSpec((bm, bn), lambda i, j: (i, j)),
        compiler_params=pltpu.CompilerParams(
            dimension_semantics=("parallel", "parallel"),
            vmem_limit_bytes=_VMEM_LIMIT_BYTES,
        ),
    )(*args)


# Fused K/V projection: each context row tile is read from HBM once and both
# projections are produced in the same grid step (two outputs).
def _kv_proj_kernel(x_ref, wk_ref, wv_ref, k_ref, v_ref):
    x = x_ref[...]
    k_ref[...] = jnp.dot(x, wk_ref[...], preferred_element_type=jnp.float32).astype(
        k_ref.dtype
    )
    v_ref[...] = jnp.dot(x, wv_ref[...], preferred_element_type=jnp.float32).astype(
        v_ref.dtype
    )


def _fused_kv_proj(ctx2d, wk_t, wv_t, *, block_rows=512, block_cols=512):
    R, Cin = ctx2d.shape
    Cout = wk_t.shape[1]
    bm = _pick_block(R, block_rows, 8)
    bn = _pick_block(Cout, block_cols, 128)
    grid = (R // bm, Cout // bn)
    out_sds = jax.ShapeDtypeStruct((R, Cout), ctx2d.dtype)
    return pl.pallas_call(
        _kv_proj_kernel,
        out_shape=(out_sds, out_sds),
        grid=grid,
        in_specs=[
            pl.BlockSpec((bm, Cin), lambda i, j: (i, 0)),
            pl.BlockSpec((Cin, bn), lambda i, j: (0, j)),
            pl.BlockSpec((Cin, bn), lambda i, j: (0, j)),
        ],
        out_specs=(
            pl.BlockSpec((bm, bn), lambda i, j: (i, j)),
            pl.BlockSpec((bm, bn), lambda i, j: (i, j)),
        ),
        compiler_params=pltpu.CompilerParams(
            dimension_semantics=("parallel", "parallel"),
            vmem_limit_bytes=_VMEM_LIMIT_BYTES,
        ),
    )(ctx2d, wk_t, wv_t)


# ---------------------------------------------------------------------------
# Chunked cross-attention kernel.
# Grid: (batch, head_group, query_tile, kv_chunk) with the kv reduction last.
# Blocks are (1, Tq|Tk, Hb*D) channel slabs of the (B, seq, C) tensors, so no
# head split/merge transposes are needed outside the kernel, and the output
# store is lane-dense.  The output block is resident across the kv axis and is
# accumulated in place (f32 activations -> no extra scratch).
# ---------------------------------------------------------------------------
def _attn_kernel(q_ref, k_ref, v_ref, o_ref, *, heads_per_block, head_dim):
    kj = pl.program_id(3)

    @pl.when(kj == 0)
    def _():
        o_ref[...] = jnp.zeros_like(o_ref)

    q = q_ref[0]  # (Tq, Hb*D) -- already scaled by head_dim**-0.5 (folded into wq)
    k = k_ref[0]  # (Tk, Hb*D)
    v = v_ref[0]  # (Tk, Hb*D)

    cols = []
    for h in range(heads_per_block):  # static unroll over the heads in this slab
        lo = h * head_dim
        hi = lo + head_dim
        qh = q[:, lo:hi]  # (Tq, D)
        kh = k[:, lo:hi]  # (Tk, D)
        vh = v[:, lo:hi]  # (Tk, D)

        # scores (Tq, Tk): contract the last dims directly -- the MXU consumes
        # the transposed operand natively, no materialized kh.T.
        s = lax.dot_general(
            qh,
            kh,
            dimension_numbers=(((1,), (1,)), ((), ())),
            preferred_element_type=jnp.float32,
        )
        # per-kv-chunk softmax (matches torch softmax(dim=-1) on the chunk);
        # chunk contributions are summed WITHOUT global renormalization.
        m = jnp.max(s, axis=-1, keepdims=True)
        p = jnp.exp(s - m)
        l = jnp.sum(p, axis=-1, keepdims=True)

        # deferred normalization: scale the (Tq, D) result instead of dividing
        # the (Tq, Tk) probability matrix.
        pv = jnp.dot(p.astype(vh.dtype), vh, preferred_element_type=jnp.float32)
        inv = pl.reciprocal(l, approx=False)  # approx=True (EUP) loosens the 1e-5 check
        cols.append(pv * inv)

    # one lane-dense (Tq, Hb*D) slab accumulate per kv chunk
    # TODO(synk): for bf16 activations accumulate in an f32 VMEM scratch instead.
    o_ref[...] += jnp.concatenate(cols, axis=-1)[None].astype(o_ref.dtype)


def _chunked_cross_attention(q, k, v, *, num_heads, chunk_size, q_block):
    B, N, C = q.shape
    M = k.shape[1]
    D = C // num_heads

    # The kv chunk size is SEMANTIC (per-chunk softmax) -> must equal chunk_size.
    Tk = min(chunk_size, M)
    if M % Tk != 0:
        # TODO(synk): ragged trailing kv chunk needs -inf masking before exp.
        raise NotImplementedError("context length must be divisible by chunk_size")
    if not (Tk % 8 == 0 or Tk == M):
        raise NotImplementedError("chunk_size must be a multiple of 8 (or >= context length)")

    Tq = _pick_block(N, q_block, 8)          # query tiling is numerically free
    Hb = _pick_head_group(num_heads, D)      # heads per grid step (channel slab)
    slab = Hb * D

    grid = (B, num_heads // Hb, N // Tq, M // Tk)
    return pl.pallas_call(
        partial(_attn_kernel, heads_per_block=Hb, head_dim=D),
        out_shape=jax.ShapeDtypeStruct((B, N, C), q.dtype),
        grid=grid,
        in_specs=[
            pl.BlockSpec((1, Tq, slab), lambda b, hg, qi, kj: (b, qi, hg)),
            pl.BlockSpec((1, Tk, slab), lambda b, hg, qi, kj: (b, kj, hg)),
            pl.BlockSpec((1, Tk, slab), lambda b, hg, qi, kj: (b, kj, hg)),
        ],
        out_specs=pl.BlockSpec((1, Tq, slab), lambda b, hg, qi, kj: (b, qi, hg)),
        compiler_params=pltpu.CompilerParams(
            dimension_semantics=("parallel", "parallel", "parallel", "arbitrary"),
            vmem_limit_bytes=_VMEM_LIMIT_BYTES,
        ),
    )(q, k, v)


# ---------------------------------------------------------------------------
# Full forward
# ---------------------------------------------------------------------------
def prepare_params(params, num_heads):
    """One-time prep outside the hot path: transpose weights to (Cin, Cout) and
    fold the 1/sqrt(head_dim) attention scale into the q projection weights."""
    C = params["wq"].shape[0]
    D = C // num_heads
    scale = float(D) ** -0.5
    return {
        "wq_t": (jnp.asarray(params["wq"]) * scale).T,
        "wk_t": jnp.asarray(params["wk"]).T,
        "wv_t": jnp.asarray(params["wv"]).T,
        "wp_t": jnp.asarray(params["wp"]).T,
        "bp": jnp.asarray(params["bp"]).reshape(1, C),
    }


@partial(jax.jit, static_argnames=("num_heads", "chunk_size", "q_block"))
def memory_efficient_cross_attention_forward(
    x, context, prepared, *, num_heads, chunk_size=128, q_block=256
):
    B, N, C = x.shape
    M = context.shape[1]

    # projections: q from x (scale folded in, qkv_bias=False -> no bias),
    # k/v fused from context (context read from HBM once).
    q2d = _tiled_linear(x.reshape(B * N, C), prepared["wq_t"])
    k2d, v2d = _fused_kv_proj(
        context.reshape(B * M, C), prepared["wk_t"], prepared["wv_t"]
    )

    # no head split/merge transposes: heads indexed via BlockSpec channel slabs
    q = q2d.reshape(B, N, C)
    k = k2d.reshape(B, M, C)
    v = v2d.reshape(B, M, C)

    attn = _chunked_cross_attention(
        q, k, v, num_heads=num_heads, chunk_size=chunk_size, q_block=q_block
    )

    out2d = _tiled_linear(attn.reshape(B * N, C), prepared["wp_t"], prepared["bp"])
    return out2d.reshape(B, N, C)


# ---------------------------------------------------------------------------
# Pure-JAX reference replicating the PyTorch module exactly (for verification)
# ---------------------------------------------------------------------------
def reference_forward(x, context, params, num_heads, chunk_size=128):
    B, N, C = x.shape
    M = context.shape[1]
    H = num_heads
    D = C // H
    scale = float(D) ** -0.5
    hp = jax.lax.Precision.HIGHEST

    q = jnp.matmul(x, params["wq"].T, precision=hp)
    k = jnp.matmul(context, params["wk"].T, precision=hp)
    v = jnp.matmul(context, params["wv"].T, precision=hp)

    q = jnp.transpose(q.reshape(B, N, H, D), (0, 2, 1, 3))
    k = jnp.transpose(k.reshape(B, M, H, D), (0, 2, 1, 3))
    v = jnp.transpose(v.reshape(B, M, H, D), (0, 2, 1, 3))

    out = jnp.zeros_like(q)
    for i in range(0, N, chunk_size):
        ei = min(i + chunk_size, N)
        acc = jnp.zeros((B, H, ei - i, D), q.dtype)
        for j in range(0, M, chunk_size):
            ej = min(j + chunk_size, M)
            attn = (
                jnp.einsum(
                    "bhqd,bhkd->bhqk", q[:, :, i:ei], k[:, :, j:ej], precision=hp
                )
                * scale
            )
            attn = jax.nn.softmax(attn, axis=-1)
            acc = acc + jnp.einsum(
                "bhqk,bhkd->bhqd", attn, v[:, :, j:ej], precision=hp
            )
        out = out.at[:, :, i:ei].set(acc)

    out = jnp.transpose(out, (0, 2, 1, 3)).reshape(B, N, C)
    return jnp.matmul(out, params["wp"].T, precision=hp) + params["bp"]


if __name__ == "__main__":
    B = 2
    N = 32          # query sequence length (x)
    M = 16          # context sequence length (k/v)
    dim = 256
    num_heads = 8   # head_dim = 32 -> 2 head groups of 4 (slab = 128 lanes)
    chunk_size = 8  # < M so the per-kv-chunk softmax accumulation is exercised
    q_block = 16    # query tiling target (numerically free) -> 2 query tiles

    key = jax.random.PRNGKey(0)
    ks = jax.random.split(key, 7)
    params = {
        "wq": 0.02 * jax.random.normal(ks[0], (dim, dim), jnp.float32),
        "wk": 0.02 * jax.random.normal(ks[1], (dim, dim), jnp.float32),
        "wv": 0.02 * jax.random.normal(ks[2], (dim, dim), jnp.float32),
        "wp": 0.02 * jax.random.normal(ks[3], (dim, dim), jnp.float32),
        "bp": 0.01 * jax.random.normal(ks[4], (dim,), jnp.float32),
    }
    x = jax.random.normal(ks[5], (B, N, dim), jnp.float32)
    context = jax.random.normal(ks[6], (B, M, dim), jnp.float32)

    prepared = prepare_params(params, num_heads)
    out = memory_efficient_cross_attention_forward(
        x, context, prepared,
        num_heads=num_heads, chunk_size=chunk_size, q_block=q_block,
    )
    out = jax.block_until_ready(out)

    ref = reference_forward(x, context, params, num_heads, chunk_size)
    assert out.shape == (B, N, dim)
    assert np.allclose(np.asarray(out), np.asarray(ref), atol=1e-5, rtol=1e-5), (
        "mismatch vs reference"
    )

    print("KERNEL_OK")
</pallas_src>

<mosaic_0001>
module attributes {stable_mosaic.version = 11 : i64} {
  func.func @_linear_bias_kernel(%arg0: i32, %arg1: i32, %arg2: memref<64x256xf32, #tpu.memory_space<vmem>>, %arg3: memref<256x256xf32, #tpu.memory_space<vmem>>, %arg4: memref<1x256xf32, #tpu.memory_space<vmem>>, %arg5: memref<64x256xf32, #tpu.memory_space<vmem>>) attributes {dimension_semantics = [#tpu.dimension_semantics<parallel>, #tpu.dimension_semantics<parallel>], iteration_bounds = array<i64: 1, 1>, scalar_prefetch = 0 : i64, scratch_operands = 0 : i64, tpu.core_type = #tpu.core_type<tc>, window_params = [{transform_indices = @transform_0, window_bounds = array<i64: 64, 256>}, {transform_indices = @transform_1, window_bounds = array<i64: 256, 256>}, {transform_indices = @transform_2, window_bounds = array<i64: 1, 256>}, {transform_indices = @transform_3, window_bounds = array<i64: 64, 256>}]} {
    %c0 = arith.constant 0 : index
    %c0_0 = arith.constant 0 : index
    %0 = vector.load %arg2[%c0, %c0_0] : memref<64x256xf32, #tpu.memory_space<vmem>>, vector<64x256xf32>
    %c0_1 = arith.constant 0 : index
    %c0_2 = arith.constant 0 : index
    %1 = vector.load %arg3[%c0_1, %c0_2] : memref<256x256xf32, #tpu.memory_space<vmem>>, vector<256x256xf32>
    %cst = arith.constant dense<0.000000e+00> : vector<64x256xf32>
    %2 = tpu.matmul %0, %1, %cst {dimension_numbers = #tpu.dot_dimension_numbers<[1], [0], [0], [1], [0, 0, 1, 1], [], []>} : vector<64x256xf32>, vector<256x256xf32>, vector<64x256xf32> -> vector<64x256xf32>
    %c0_3 = arith.constant 0 : index
    %c0_4 = arith.constant 0 : index
    %3 = vector.load %arg4[%c0_3, %c0_4] : memref<1x256xf32, #tpu.memory_space<vmem>>, vector<1x256xf32>
    %4 = vector.broadcast %3 : vector<1x256xf32> to vector<64x256xf32>
    %5 = arith.addf %2, %4 : vector<64x256xf32>
    %c0_5 = arith.constant 0 : index
    %c0_6 = arith.constant 0 : index
    %6 = vector.load %arg5[%c0_5, %c0_6] : memref<64x256xf32, #tpu.memory_space<vmem>>, vector<64x256xf32>
    tpu.vector_store %arg5[%c0_5, %c0_6], %5 {strides = array<i32>} : memref<64x256xf32, #tpu.memory_space<vmem>>, vector<64x256xf32>,
    return
  }
  func.func @transform_0(%arg0: i32, %arg1: i32) -> (i32, i32) {
    %c0_i32 = arith.constant 0 : i32
    %c0_i32_0 = arith.constant 0 : i32
    return %arg0, %c0_i32 : i32, i32
  }
  func.func @transform_1(%arg0: i32, %arg1: i32) -> (i32, i32) {
    %c0_i32 = arith.constant 0 : i32
    %c0_i32_0 = arith.constant 0 : i32
    return %c0_i32, %arg1 : i32, i32
  }
  func.func @transform_2(%arg0: i32, %arg1: i32) -> (i32, i32) {
    %c0_i32 = arith.constant 0 : i32
    %c0_i32_0 = arith.constant 0 : i32
    return %c0_i32, %arg1 : i32, i32
  }
  func.func @transform_3(%arg0: i32, %arg1: i32) -> (i32, i32) {
    %c0_i32 = arith.constant 0 : i32
    return %arg0, %arg1 : i32, i32
  }
}

module attributes {stable_mosaic.version = 11 : i64} {
  func.func @_attn_kernel(%arg0: i32, %arg1: i32, %arg2: i32, %arg3: i32, %arg4: memref<1x16x128xf32, #tpu.memory_space<vmem>>, %arg5: memref<1x8x128xf32, #tpu.memory_space<vmem>>, %arg6: memref<1x8x128xf32, #tpu.memory_space<vmem>>, %arg7: memref<1x16x128xf32, #tpu.memory_space<vmem>>) attributes {dimension_semantics = [#tpu.dimension_semantics<parallel>, #tpu.dimension_semantics<parallel>, #tpu.dimension_semantics<parallel>, #tpu.dimension_semantics<arbitrary>], iteration_bounds = array<i64: 2, 2, 2, 2>, scalar_prefetch = 0 : i64, scratch_operands = 0 : i64, tpu.core_type = #tpu.core_type<tc>, window_params = [{transform_indices = @transform_0, window_bounds = array<i64: 1, 16, 128>}, {transform_indices = @transform_1, window_bounds = array<i64: 1, 8, 128>}, {transform_indices = @transform_2, window_bounds = array<i64: 1, 8, 128>}, {transform_indices = @transform_3, window_bounds = array<i64: 1, 16, 128>}]} {
    %c0_i32 = arith.constant 0 : i32
    %0 = arith.cmpi eq, %arg3, %c0_i32 : i32
    %1 = arith.extui %0 : i1 to i32
    %c0_i32_0 = arith.constant 0 : i32
    %2 = arith.cmpi ne, %1, %c0_i32_0 : i32
    scf.if %2 {
      %cst_30 = arith.constant 0.000000e+00 : f32
      %74 = vector.broadcast %cst_30 : f32 to vector<1x16x128xf32>
      %c0_31 = arith.constant 0 : index
      %c0_32 = arith.constant 0 : index
      %c0_33 = arith.constant 0 : index
      %75 = vector.load %arg7[%c0_31, %c0_32, %c0_33] : memref<1x16x128xf32, #tpu.memory_space<vmem>>, vector<1x16x128xf32>
      tpu.vector_store %arg7[%c0_31, %c0_32, %c0_33], %74 {strides = array<i32>} : memref<1x16x128xf32, #tpu.memory_space<vmem>>, vector<1x16x128xf32>,
    } else {
    }
    %c0 = arith.constant 0 : index
    %c0_1 = arith.constant 0 : index
    %c0_2 = arith.constant 0 : index
    %3 = vector.load %arg4[%c0, %c0_1, %c0_2] : memref<1x16x128xf32, #tpu.memory_space<vmem>>, vector<1x16x128xf32>
    %4 = vector.shape_cast %3 : vector<1x16x128xf32> to vector<16x128xf32>
    %c0_3 = arith.constant 0 : index
    %c0_4 = arith.constant 0 : index
    %c0_5 = arith.constant 0 : index
    %5 = vector.load %arg5[%c0_3, %c0_4, %c0_5] : memref<1x8x128xf32, #tpu.memory_space<vmem>>, vector<1x8x128xf32>
    %6 = vector.shape_cast %5 : vector<1x8x128xf32> to vector<8x128xf32>
    %c0_6 = arith.constant 0 : index
    %c0_7 = arith.constant 0 : index
    %c0_8 = arith.constant 0 : index
    %7 = vector.load %arg6[%c0_6, %c0_7, %c0_8] : memref<1x8x128xf32, #tpu.memory_space<vmem>>, vector<1x8x128xf32>
    %8 = vector.shape_cast %7 : vector<1x8x128xf32> to vector<8x128xf32>
    %9 = vector.extract_strided_slice %4 {offsets = [0, 0], sizes = [16, 32], strides = [1, 1]} : vector<16x128xf32> to vector<16x32xf32>
    %10 = vector.extract_strided_slice %6 {offsets = [0, 0], sizes = [8, 32], strides = [1, 1]} : vector<8x128xf32> to vector<8x32xf32>
    %11 = vector.extract_strided_slice %8 {offsets = [0, 0], sizes = [8, 32], strides = [1, 1]} : vector<8x128xf32> to vector<8x32xf32>
    %cst = arith.constant dense<0.000000e+00> : vector<16x8xf32>
    %12 = tpu.matmul %9, %10, %cst {dimension_numbers = #tpu.dot_dimension_numbers<[1], [1], [0], [0], [0, 0, 1, 0], [], []>} : vector<16x32xf32>, vector<8x32xf32>, vector<16x8xf32> -> vector<16x8xf32>
    %cst_9 = arith.constant dense<0xFF800000> : vector<16xf32>
    %13 = vector.multi_reduction <maximumf>, %12, %cst_9 [1] : vector<16x8xf32> to vector<16xf32>
    %14 = vector.shape_cast %13 : vector<16xf32> to vector<16x1xf32>
    %15 = vector.broadcast %14 : vector<16x1xf32> to vector<16x8xf32>
    %16 = arith.subf %12, %15 : vector<16x8xf32>
    %17 = math.exp %16 : vector<16x8xf32>
    %cst_10 = arith.constant dense<0.000000e+00> : vector<16xf32>
    %18 = vector.multi_reduction <add>, %17, %cst_10 [1] : vector<16x8xf32> to vector<16xf32>
    %19 = vector.shape_cast %18 : vector<16xf32> to vector<16x1xf32>
    %cst_11 = arith.constant dense<0.000000e+00> : vector<16x32xf32>
    %20 = tpu.matmul %17, %11, %cst_11 {dimension_numbers = #tpu.dot_dimension_numbers<[1], [0], [0], [1], [0, 0, 1, 1], [], []>} : vector<16x8xf32>, vector<8x32xf32>, vector<16x32xf32> -> vector<16x32xf32>
    %21 = tpu.reciprocal %19 : vector<16x1xf32> -> vector<16x1xf32>
    %22 = vector.broadcast %21 : vector<16x1xf32> to vector<16x32xf32>
    %23 = arith.mulf %20, %22 : vector<16x32xf32>
    %24 = vector.extract_strided_slice %4 {offsets = [0, 32], sizes = [16, 32], strides = [1, 1]} : vector<16x128xf32> to vector<16x32xf32>
    %25 = vector.extract_strided_slice %6 {offsets = [0, 32], sizes = [8, 32], strides = [1, 1]} : vector<8x128xf32> to vector<8x32xf32>
    %26 = vector.extract_strided_slice %8 {offsets = [0, 32], sizes = [8, 32], strides = [1, 1]} : vector<8x128xf32> to vector<8x32xf32>
    %cst_12 = arith.constant dense<0.000000e+00> : vector<16x8xf32>
    %27 = tpu.matmul %24, %25, %cst_12 {dimension_numbers = #tpu.dot_dimension_numbers<[1], [1], [0], [0], [0, 0, 1, 0], [], []>} : vector<16x32xf32>, vector<8x32xf32>, vector<16x8xf32> -> vector<16x8xf32>
    %cst_13 = arith.constant dense<0xFF800000> : vector<16xf32>
    %28 = vector.multi_reduction <maximumf>, %27, %cst_13 [1] : vector<16x8xf32> to vector<16xf32>
    %29 = vector.shape_cast %28 : vector<16xf32> to vector<16x1xf32>
    %30 = vector.broadcast %29 : vector<16x1xf32> to vector<16x8xf32>
    %31 = arith.subf %27, %30 : vector<16x8xf32>
    %32 = math.exp %31 : vector<16x8xf32>
    %cst_14 = arith.constant dense<0.000000e+00> : vector<16xf32>
    %33 = vector.multi_reduction <add>, %32, %cst_14 [1] : vector<16x8xf32> to vector<16xf32>
    %34 = vector.shape_cast %33 : vector<16xf32> to vector<16x1xf32>
    %cst_15 = arith.constant dense<0.000000e+00> : vector<16x32xf32>
    %35 = tpu.matmul %32, %26, %cst_15 {dimension_numbers = #tpu.dot_dimension_numbers<[1], [0], [0], [1], [0, 0, 1, 1], [], []>} : vector<16x8xf32>, vector<8x32xf32>, vector<16x32xf32> -> vector<16x32xf32>
    %36 = tpu.reciprocal %34 : vector<16x1xf32> -> vector<16x1xf32>
    %37 = vector.broadcast %36 : vector<16x1xf32> to vector<16x32xf32>
    %38 = arith.mulf %35, %37 : vector<16x32xf32>
    %39 = vector.extract_strided_slice %4 {offsets = [0, 64], sizes = [16, 32], strides = [1, 1]} : vector<16x128xf32> to vector<16x32xf32>
    %40 = vector.extract_strided_slice %6 {offsets = [0, 64], sizes = [8, 32], strides = [1, 1]} : vector<8x128xf32> to vector<8x32xf32>
    %41 = vector.extract_strided_slice %8 {offsets = [0, 64], sizes = [8, 32], strides = [1, 1]} : vector<8x128xf32> to vector<8x32xf32>
    %cst_16 = arith.constant dense<0.000000e+00> : vector<16x8xf32>
    %42 = tpu.matmul %39, %40, %cst_16 {dimension_numbers = #tpu.dot_dimension_numbers<[1], [1], [0], [0], [0, 0, 1, 0], [], []>} : vector<16x32xf32>, vector<8x32xf32>, vector<16x8xf32> -> vector<16x8xf32>
    %cst_17 = arith.constant dense<0xFF800000> : vector<16xf32>
    %43 = vector.multi_reduction <maximumf>, %42, %cst_17 [1] : vector<16x8xf32> to vector<16xf32>
    %44 = vector.shape_cast %43 : vector<16xf32> to vector<16x1xf32>
    %45 = vector.broadcast %44 : vector<16x1xf32> to vector<16x8xf32>
    %46 = arith.subf %42, %45 : vector<16x8xf32>
    %47 = math.exp %46 : vector<16x8xf32>
    %cst_18 = arith.constant dense<0.000000e+00> : vector<16xf32>
    %48 = vector.multi_reduction <add>, %47, %cst_18 [1] : vector<16x8xf32> to vector<16xf32>
    %49 = vector.shape_cast %48 : vector<16xf32> to vector<16x1xf32>
    %cst_19 = arith.constant dense<0.000000e+00> : vector<16x32xf32>
    %50 = tpu.matmul %47, %41, %cst_19 {dimension_numbers = #tpu.dot_dimension_numbers<[1], [0], [0], [1], [0, 0, 1, 1], [], []>} : vector<16x8xf32>, vector<8x32xf32>, vector<16x32xf32> -> vector<16x32xf32>
    %51 = tpu.reciprocal %49 : vector<16x1xf32> -> vector<16x1xf32>
    %52 = vector.broadcast %51 : vector<16x1xf32> to vector<16x32xf32>
    %53 = arith.mulf %50, %52 : vector<16x32xf32>
    %54 = vector.extract_strided_slice %4 {offsets = [0, 96], sizes = [16, 32], strides = [1, 1]} : vector<16x128xf32> to vector<16x32xf32>
    %55 = vector.extract_strided_slice %6 {offsets = [0, 96], sizes = [8, 32], strides = [1, 1]} : vector<8x128xf32> to vector<8x32xf32>
    %56 = vector.extract_strided_slice %8 {offsets = [0, 96], sizes = [8, 32], strides = [1, 1]} : vector<8x128xf32> to vector<8x32xf32>
    %cst_20 = arith.constant dense<0.000000e+00> : vector<16x8xf32>
    %57 = tpu.matmul %54, %55, %cst_20 {dimension_numbers = #tpu.dot_dimension_numbers<[1], [1], [0], [0], [0, 0, 1, 0], [], []>} : vector<16x32xf32>, vector<8x32xf32>, vector<16x8xf32> -> vector<16x8xf32>
    %cst_21 = arith.constant dense<0xFF800000> : vector<16xf32>
    %58 = vector.multi_reduction <maximumf>, %57, %cst_21 [1] : vector<16x8xf32> to vector<16xf32>
    %59 = vector.shape_cast %58 : vector<16xf32> to vector<16x1xf32>
    %60 = vector.broadcast %59 : vector<16x1xf32> to vector<16x8xf32>
    %61 = arith.subf %57, %60 : vector<16x8xf32>
    %62 = math.exp %61 : vector<16x8xf32>
    %cst_22 = arith.constant dense<0.000000e+00> : vector<16xf32>
    %63 = vector.multi_reduction <add>, %62, %cst_22 [1] : vector<16x8xf32> to vector<16xf32>
    %64 = vector.shape_cast %63 : vector<16xf32> to vector<16x1xf32>
    %cst_23 = arith.constant dense<0.000000e+00> : vector<16x32xf32>
    %65 = tpu.matmul %62, %56, %cst_23 {dimension_numbers = #tpu.dot_dimension_numbers<[1], [0], [0], [1], [0, 0, 1, 1], [], []>} : vector<16x8xf32>, vector<8x32xf32>, vector<16x32xf32> -> vector<16x32xf32>
    %66 = tpu.reciprocal %64 : vector<16x1xf32> -> vector<16x1xf32>
    %67 = vector.broadcast %66 : vector<16x1xf32> to vector<16x32xf32>
    %68 = arith.mulf %65, %67 : vector<16x32xf32>
    %c0_24 = arith.constant 0 : index
    %c0_25 = arith.constant 0 : index
    %c0_26 = arith.constant 0 : index
    %69 = vector.load %arg7[%c0_24, %c0_25, %c0_26] : memref<1x16x128xf32, #tpu.memory_space<vmem>>, vector<1x16x128xf32>
    %70 = tpu.concatenate %23, %38, %53, %68 in 1 : vector<16x32xf32>, vector<16x32xf32>, vector<16x32xf32>, vector<16x32xf32> -> vector<16x128xf32>
    %71 = vector.shape_cast %70 : vector<16x128xf32> to vector<1x16x128xf32>
    %72 = arith.addf %69, %71 : vector<1x16x128xf32>
    %c0_27 = arith.constant 0 : index
    %c0_28 = arith.constant 0 : index
    %c0_29 = arith.constant 0 : index
    %73 = vector.load %arg7[%c0_27, %c0_28, %c0_29] : memref<1x16x128xf32, #tpu.memory_space<vmem>>, vector<1x16x128xf32>
    tpu.vector_store %arg7[%c0_27, %c0_28, %c0_29], %72 {strides = array<i32>} : memref<1x16x128xf32, #tpu.memory_space<vmem>>, vector<1x16x128xf32>,
    return
  }
  func.func @transform_0(%arg0: i32, %arg1: i32, %arg2: i32, %arg3: i32) -> (i32, i32, i32) {
    %c0_i32 = arith.constant 0 : i32
    return %arg0, %arg2, %arg1 : i32, i32, i32
  }
  func.func @transform_1(%arg0: i32, %arg1: i32, %arg2: i32, %arg3: i32) -> (i32, i32, i32) {
    %c0_i32 = arith.constant 0 : i32
    return %arg0, %arg3, %arg1 : i32, i32, i32
  }
  func.func @transform_2(%arg0: i32, %arg1: i32, %arg2: i32, %arg3: i32) -> (i32, i32, i32) {
    %c0_i32 = arith.constant 0 : i32
    return %arg0, %arg3, %arg1 : i32, i32, i32
  }
  func.func @transform_3(%arg0: i32, %arg1: i32, %arg2: i32, %arg3: i32) -> (i32, i32, i32) {
    %c0_i32 = arith.constant 0 : i32
    return %arg0, %arg2, %arg1 : i32, i32, i32
  }
}

module attributes {stable_mosaic.version = 11 : i64} {
  func.func @_linear_kernel(%arg0: i32, %arg1: i32, %arg2: memref<64x256xf32, #tpu.memory_space<vmem>>, %arg3: memref<256x256xf32, #tpu.memory_space<vmem>>, %arg4: memref<64x256xf32, #tpu.memory_space<vmem>>) attributes {dimension_semantics = [#tpu.dimension_semantics<parallel>, #tpu.dimension_semantics<parallel>], iteration_bounds = array<i64: 1, 1>, scalar_prefetch = 0 : i64, scratch_operands = 0 : i64, tpu.core_type = #tpu.core_type<tc>, window_params = [{transform_indices = @transform_0, window_bounds = array<i64: 64, 256>}, {transform_indices = @transform_1, window_bounds = array<i64: 256, 256>}, {transform_indices = @transform_2, window_bounds = array<i64: 64, 256>}]} {
    %c0 = arith.constant 0 : index
    %c0_0 = arith.constant 0 : index
    %0 = vector.load %arg2[%c0, %c0_0] : memref<64x256xf32, #tpu.memory_space<vmem>>, vector<64x256xf32>
    %c0_1 = arith.constant 0 : index
    %c0_2 = arith.constant 0 : index
    %1 = vector.load %arg3[%c0_1, %c0_2] : memref<256x256xf32, #tpu.memory_space<vmem>>, vector<256x256xf32>
    %cst = arith.constant dense<0.000000e+00> : vector<64x256xf32>
    %2 = tpu.matmul %0, %1, %cst {dimension_numbers = #tpu.dot_dimension_numbers<[1], [0], [0], [1], [0, 0, 1, 1], [], []>} : vector<64x256xf32>, vector<256x256xf32>, vector<64x256xf32> -> vector<64x256xf32>
    %c0_3 = arith.constant 0 : index
    %c0_4 = arith.constant 0 : index
    %3 = vector.load %arg4[%c0_3, %c0_4] : memref<64x256xf32, #tpu.memory_space<vmem>>, vector<64x256xf32>
    tpu.vector_store %arg4[%c0_3, %c0_4], %2 {strides = array<i32>} : memref<64x256xf32, #tpu.memory_space<vmem>>, vector<64x256xf32>,
    return
  }
  func.func @transform_0(%arg0: i32, %arg1: i32) -> (i32, i32) {
    %c0_i32 = arith.constant 0 : i32
    %c0_i32_0 = arith.constant 0 : i32
    return %arg0, %c0_i32 : i32, i32
  }
  func.func @transform_1(%arg0: i32, %arg1: i32) -> (i32, i32) {
    %c0_i32 = arith.constant 0 : i32
    %c0_i32_0 = arith.constant 0 : i32
    return %c0_i32, %arg1 : i32, i32
  }
  func.func @transform_2(%arg0: i32, %arg1: i32) -> (i32, i32) {
    %c0_i32 = arith.constant 0 : i32
    return %arg0, %arg1 : i32, i32
  }
}

module attributes {stable_mosaic.version = 11 : i64} {
  func.func @_kv_proj_kernel(%arg0: i32, %arg1: i32, %arg2: memref<32x256xf32, #tpu.memory_space<vmem>>, %arg3: memref<256x256xf32, #tpu.memory_space<vmem>>, %arg4: memref<256x256xf32, #tpu.memory_space<vmem>>, %arg5: memref<32x256xf32, #tpu.memory_space<vmem>>, %arg6: memref<32x256xf32, #tpu.memory_space<vmem>>) attributes {dimension_semantics = [#tpu.dimension_semantics<parallel>, #tpu.dimension_semantics<parallel>], iteration_bounds = array<i64: 1, 1>, scalar_prefetch = 0 : i64, scratch_operands = 0 : i64, tpu.core_type = #tpu.core_type<tc>, window_params = [{transform_indices = @transform_0, window_bounds = array<i64: 32, 256>}, {transform_indices = @transform_1, window_bounds = array<i64: 256, 256>}, {transform_indices = @transform_2, window_bounds = array<i64: 256, 256>}, {transform_indices = @transform_3, window_bounds = array<i64: 32, 256>}, {transform_indices = @transform_4, window_bounds = array<i64: 32, 256>}]} {
    %c0 = arith.constant 0 : index
    %c0_0 = arith.constant 0 : index
    %0 = vector.load %arg2[%c0, %c0_0] : memref<32x256xf32, #tpu.memory_space<vmem>>, vector<32x256xf32>
    %c0_1 = arith.constant 0 : index
    %c0_2 = arith.constant 0 : index
    %1 = vector.load %arg3[%c0_1, %c0_2] : memref<256x256xf32, #tpu.memory_space<vmem>>, vector<256x256xf32>
    %cst = arith.constant dense<0.000000e+00> : vector<32x256xf32>
    %2 = tpu.matmul %0, %1, %cst {dimension_numbers = #tpu.dot_dimension_numbers<[1], [0], [0], [1], [0, 0, 1, 1], [], []>} : vector<32x256xf32>, vector<256x256xf32>, vector<32x256xf32> -> vector<32x256xf32>
    %c0_3 = arith.constant 0 : index
    %c0_4 = arith.constant 0 : index
    %3 = vector.load %arg5[%c0_3, %c0_4] : memref<32x256xf32, #tpu.memory_space<vmem>>, vector<32x256xf32>
    tpu.vector_store %arg5[%c0_3, %c0_4], %2 {strides = array<i32>} : memref<32x256xf32, #tpu.memory_space<vmem>>, vector<32x256xf32>,
    %c0_5 = arith.constant 0 : index
    %c0_6 = arith.constant 0 : index
    %4 = vector.load %arg4[%c0_5, %c0_6] : memref<256x256xf32, #tpu.memory_space<vmem>>, vector<256x256xf32>
    %cst_7 = arith.constant dense<0.000000e+00> : vector<32x256xf32>
    %5 = tpu.matmul %0, %4, %cst_7 {dimension_numbers = #tpu.dot_dimension_numbers<[1], [0], [0], [1], [0, 0, 1, 1], [], []>} : vector<32x256xf32>, vector<256x256xf32>, vector<32x256xf32> -> vector<32x256xf32>
    %c0_8 = arith.constant 0 : index
    %c0_9 = arith.constant 0 : index
    %6 = vector.load %arg6[%c0_8, %c0_9] : memref<32x256xf32, #tpu.memory_space<vmem>>, vector<32x256xf32>
    tpu.vector_store %arg6[%c0_8, %c0_9], %5 {strides = array<i32>} : memref<32x256xf32, #tpu.memory_space<vmem>>, vector<32x256xf32>,
    return
  }
  func.func @transform_0(%arg0: i32, %arg1: i32) -> (i32, i32) {
    %c0_i32 = arith.constant 0 : i32
    %c0_i32_0 = arith.constant 0 : i32
    return %arg0, %c0_i32 : i32, i32
  }
  func.func @transform_1(%arg0: i32, %arg1: i32) -> (i32, i32) {
    %c0_i32 = arith.constant 0 : i32
    %c0_i32_0 = arith.constant 0 : i32
    return %c0_i32, %arg1 : i32, i32
  }
  func.func @transform_2(%arg0: i32, %arg1: i32) -> (i32, i32) {
    %c0_i32 = arith.constant 0 : i32
    %c0_i32_0 = arith.constant 0 : i32
    return %c0_i32, %arg1 : i32, i32
  }
  func.func @transform_3(%arg0: i32, %arg1: i32) -> (i32, i32) {
    %c0_i32 = arith.constant 0 : i32
    return %arg0, %arg1 : i32, i32
  }
  func.func @transform_4(%arg0: i32, %arg1: i32) -> (i32, i32) {
    %c0_i32 = arith.constant 0 : i32
    return %arg0, %arg1 : i32, i32
  }
}

</mosaic_0001>

<bundles_post_ra>
// kernel: memory_efficient_cross_attention_forward.4
= control target key start
LH: loop header
LB: loop body
LE: loop exit
PB: predicated region body
PF: predicated region fallthrough
CT: control target
= control target key end

     0   :  { %7 = vsyncpa [#allocation3], 0  ;;  %s438_s0 = inlined_call_operand.hbm [shape: f32[64,256], index: 0, kind: input, shape index: {}]   ;;  %s439_s1 = inlined_call_operand.hbm [shape: f32[256,256], index: 1, kind: input, shape index: {}]   ;;  %s440_s2 = inlined_call_operand.vmem [shape: f32[64,256], index: 2, kind: output, shape index: {}]  }
   0x1   :  { %s13_s11 = sshll.u32 %s438_s0, 4  ;;  %s14_s11 = int_to_ptr.hbm [resolvable:$true] %s13_s11 }
   0x2   :  { %8 = vsyncpa [#allocation5], 0  ;;  %s365_s12 = smov [#allocation2]   ;;  %s26_s16 = sshll.u32 %s439_s1, 4  ;;  %s27_s16 = int_to_ptr.hbm [resolvable:$true] %s26_s16 }
   0x3   :  { %s15_s13 = sshll.u32 %s365_s12, 4  ;;  %s366_s17 = smov 256   ;;  %s16_s13 = int_to_ptr.vmem [resolvable:$true] %s15_s13 }
   0x4   :  { %s367_s18 = smov 16   ;;  %s368_s19 = smov [#allocation4]  }
   0x5   :  { %21 = dma.hbm_to_vmem [thread:$0]  %s14_s11, 2048, %s16_s13, [#allocation3], %s366_s17, %s366_s17, %s367_s18  }
   0x6   :  { %s28_s20 = sshll.u32 %s368_s19, 4  ;;  %s29_s20 = int_to_ptr.vmem [resolvable:$true] %s28_s20 }
   0x7   :  { %34 = dma.hbm_to_vmem [thread:$0]  %s27_s16, 8192, %s29_s20, [#allocation5], %s366_s17, %s366_s17, %s367_s18  }
   0x8   :  { %361 = dma.done.wait [#allocation3], 2048  }
   0x9   :  { %362 = vsyncadd [#allocation3], 4294965248 }
   0xa   :  { %363 = dma.done.wait [#allocation5], 8192  }
   0xb   :  { %364 = vsyncadd [#allocation5], 4294959104  ;;  %v90_v0 = vld [vmem:[#allocation4 + $0xf8] sm:$0xff]  ;;  %v88_v2 = vld [vmem:[#allocation4 + $0xe8] sm:$0xff] }
   0xc   :  { %v122_v1 = vld [vmem:[#allocation4 + $0x1f8] sm:$0xff]  ;;  %205 = vmatpush.msra.mxu2 %v90_v0  ;;  %v120_v3 = vld [vmem:[#allocation4 + $0x1e8] sm:$0xff]  ;;  %v89_v6 = vld [vmem:[#allocation4 + $0xf0] sm:$0xff] }
   0xd   :  { %246 = vmatpush.msra.mxu3 %v122_v1  ;;  %v86_v4 = vld [vmem:[#allocation4 + $0xd8] sm:$0xff]  ;;  %v121_v7 = vld [vmem:[#allocation4 + $0x1f0] sm:$0xff]  ;;  %v87_v8 = vld [vmem:[#allocation4 + $0xe0] sm:$0xff]  ;;  %123 = vmatpush.msra.mxu0 %v89_v6 }
   0xe   :  { %v118_v5 = vld [vmem:[#allocation4 + $0x1d8] sm:$0xff]  ;;  %206 = vmatpush.msra.mxu2 %v88_v2  ;;  %v119_v9 = vld [vmem:[#allocation4 + $0x1e0] sm:$0xff]  ;;  %164 = vmatpush.msra.mxu1 %v121_v7  ;;  %v84_v10 = vld [vmem:[#allocation4 + $0xc8] sm:$0xff] }
   0xf   :  { %247 = vmatpush.msra.mxu3 %v120_v3  ;;  %v116_v11 = vld [vmem:[#allocation4 + $0x1c8] sm:$0xff]  ;;  %v85_v12 = vld [vmem:[#allocation4 + $0xd0] sm:$0xff]  ;;  %124 = vmatpush.msra.mxu0 %v87_v8  ;;  %v82_v14 = vld [vmem:[#allocation4 + $0xb8] sm:$0xff] }
  0x10   :  { %207 = vmatpush.msra.mxu2 %v86_v4  ;;  %v117_v13 = vld [vmem:[#allocation4 + $0x1d0] sm:$0xff]  ;;  %165 = vmatpush.msra.mxu1 %v119_v9  ;;  %v114_v15 = vld [vmem:[#allocation4 + $0x1b8] sm:$0xff]  ;;  %v83_v16 = vld [vmem:[#allocation4 + $0xc0] sm:$0xff] }
  0x11   :  { %248 = vmatpush.msra.mxu3 %v118_v5  ;;  %v115_v17 = vld [vmem:[#allocation4 + $0x1c0] sm:$0xff]  ;;  %125 = vmatpush.msra.mxu0 %v85_v12  ;;  %v80_v18 = vld [vmem:[#allocation4 + $0xa8] sm:$0xff]  ;;  %v81_v20 = vld [vmem:[#allocation4 + $0xb0] sm:$0xff] }
  0x12   :  { %208 = vmatpush.msra.mxu2 %v84_v10  ;;  %166 = vmatpush.msra.mxu1 %v117_v13  ;;  %v112_v19 = vld [vmem:[#allocation4 + $0x1a8] sm:$0xff]  ;;  %v113_v21 = vld [vmem:[#allocation4 + $0x1b0] sm:$0xff]  ;;  %v78_v22 = vld [vmem:[#allocation4 + $0x98] sm:$0xff] }
  0x13   :  { %249 = vmatpush.msra.mxu3 %v116_v11  ;;  %126 = vmatpush.msra.mxu0 %v83_v16  ;;  %v110_v23 = vld [vmem:[#allocation4 + $0x198] sm:$0xff]  ;;  %v79_v24 = vld [vmem:[#allocation4 + $0xa0] sm:$0xff]  ;;  %v76_v26 = vld [vmem:[#allocation4 + $0x88] sm:$0xff] }
  0x14   :  { %209 = vmatpush.msra.mxu2 %v82_v14  ;;  %167 = vmatpush.msra.mxu1 %v115_v17  ;;  %v111_v25 = vld [vmem:[#allocation4 + $0x1a0] sm:$0xff]  ;;  %v108_v27 = vld [vmem:[#allocation4 + $0x188] sm:$0xff]  ;;  %v77_v28 = vld [vmem:[#allocation4 + $0x90] sm:$0xff] }
  0x15   :  { %250 = vmatpush.msra.mxu3 %v114_v15  ;;  %127 = vmatpush.msra.mxu0 %v81_v20  ;;  %v109_v29 = vld [vmem:[#allocation4 + $0x190] sm:$0xff]  ;;  %v74_v30 = vld [vmem:[#allocation4 + $0x78] sm:$0xff]  ;;  %v75_v32 = vld [vmem:[#allocation4 + $0x80] sm:$0xff] }
  0x16   :  { %210 = vmatpush.msra.mxu2 %v80_v18  ;;  %168 = vmatpush.msra.mxu1 %v113_v21  ;;  %v106_v31 = vld [vmem:[#allocation4 + $0x178] sm:$0xff]  ;;  %v107_v33 = vld [vmem:[#allocation4 + $0x180] sm:$0xff]  ;;  %v72_v34 = vld [vmem:[#allocation4 + $0x68] sm:$0xff] }
  0x17   :  { %251 = vmatpush.msra.mxu3 %v112_v19  ;;  %128 = vmatpush.msra.mxu0 %v79_v24  ;;  %v104_v35 = vld [vmem:[#allocation4 + $0x168] sm:$0xff]  ;;  %v73_v36 = vld [vmem:[#allocation4 + $0x70] sm:$0xff]  ;;  %v70_v38 = vld [vmem:[#allocation4 + $0x58] sm:$0xff] }
  0x18   :  { %211 = vmatpush.msra.mxu2 %v78_v22  ;;  %169 = vmatpush.msra.mxu1 %v111_v25  ;;  %v105_v37 = vld [vmem:[#allocation4 + $0x170] sm:$0xff]  ;;  %v102_v39 = vld [vmem:[#allocation4 + $0x158] sm:$0xff]  ;;  %v71_v40 = vld [vmem:[#allocation4 + $0x60] sm:$0xff] }
  0x19   :  { %252 = vmatpush.msra.mxu3 %v110_v23  ;;  %129 = vmatpush.msra.mxu0 %v77_v28  ;;  %v103_v41 = vld [vmem:[#allocation4 + $0x160] sm:$0xff]  ;;  %v68_v42 = vld [vmem:[#allocation4 + $0x48] sm:$0xff]  ;;  %v69_v44 = vld [vmem:[#allocation4 + $0x50] sm:$0xff] }
  0x1a   :  { %212 = vmatpush.msra.mxu2 %v76_v26  ;;  %170 = vmatpush.msra.mxu1 %v109_v29  ;;  %v100_v43 = vld [vmem:[#allocation4 + $0x148] sm:$0xff]  ;;  %v101_v45 = vld [vmem:[#allocation4 + $0x150] sm:$0xff]  ;;  %v66_v46 = vld [vmem:[#allocation4 + $0x38] sm:$0xff] }
  0x1b   :  { %253 = vmatpush.msra.mxu3 %v108_v27  ;;  %130 = vmatpush.msra.mxu0 %v75_v32  ;;  %v98_v47 = vld [vmem:[#allocation4 + $0x138] sm:$0xff]  ;;  %v67_v48 = vld [vmem:[#allocation4 + $0x40] sm:$0xff]  ;;  %v64_v50 = vld [vmem:[#allocation4 + $0x28] sm:$0xff] }
  0x1c   :  { %213 = vmatpush.msra.mxu2 %v74_v30  ;;  %171 = vmatpush.msra.mxu1 %v107_v33  ;;  %v99_v49 = vld [vmem:[#allocation4 + $0x140] sm:$0xff]  ;;  %v96_v51 = vld [vmem:[#allocation4 + $0x128] sm:$0xff]  ;;  %v65_v52 = vld [vmem:[#allocation4 + $0x30] sm:$0xff] }
  0x1d   :  { %254 = vmatpush.msra.mxu3 %v106_v31  ;;  %131 = vmatpush.msra.mxu0 %v73_v36  ;;  %v97_v53 = vld [vmem:[#allocation4 + $0x130] sm:$0xff]  ;;  %v62_v54 = vld [vmem:[#allocation4 + $0x18] sm:$0xff]  ;;  %v63_v56 = vld [vmem:[#allocation4 + $0x20] sm:$0xff] }
  0x1e   :  { %214 = vmatpush.msra.mxu2 %v72_v34  ;;  %172 = vmatpush.msra.mxu1 %v105_v37  ;;  %v94_v55 = vld [vmem:[#allocation4 + $0x118] sm:$0xff]  ;;  %v95_v57 = vld [vmem:[#allocation4 + $0x120] sm:$0xff]  ;;  %v60_v58 = vld [vmem:[#allocation4 + $0x8] sm:$0xff] }
  0x1f   :  { %255 = vmatpush.msra.mxu3 %v104_v35  ;;  %132 = vmatpush.msra.mxu0 %v71_v40  ;;  %v92_v59 = vld [vmem:[#allocation4 + $0x108] sm:$0xff]  ;;  %v43_v60 = vld [vmem:[#allocation2] sm:$0xff]  ;;  %v61_v62 = vld [vmem:[#allocation4 + $0x10] sm:$0xff] }
  0x20   :  { %215 = vmatpush.msra.mxu2 %v70_v38  ;;  %173 = vmatpush.msra.mxu1 %v103_v41  ;;  %v44_v61 = vld [vmem:[#allocation2 + $0x8] sm:$0xff]  ;;  %v93_v63 = vld [vmem:[#allocation4 + $0x110] sm:$0xff]  ;;  %v59_v0 = vld [vmem:[#allocation4] sm:$0xff] }
  0x21   :  { %256 = vmatpush.msra.mxu3 %v102_v39  ;;  %133 = vmatpush.msra.mxu0 %v69_v44  ;;  %v91_v1 = vld [vmem:[#allocation4 + $0x100] sm:$0xff]  ;;  %v45_v2 = vld [vmem:[#allocation2 + $0x10] sm:$0xff]  ;;  %v46_v3 = vld [vmem:[#allocation2 + $0x18] sm:$0xff] }
  0x22   :  { %216 = vmatpush.msra.mxu2 %v68_v42  ;;  %174 = vmatpush.msra.mxu1 %v101_v45  ;;  %v47_v4 = vld [vmem:[#allocation2 + $0x20] sm:$0xff]  ;;  %v48_v5 = vld [vmem:[#allocation2 + $0x28] sm:$0xff]  ;;  %v49_v6 = vld [vmem:[#allocation2 + $0x30] sm:$0xff] }
  0x23   :  { %257 = vmatpush.msra.mxu3 %v100_v43  ;;  %134 = vmatpush.msra.mxu0 %v67_v48  ;;  %v50_v7 = vld [vmem:[#allocation2 + $0x38] sm:$0xff]  ;;  %v51_v8 = vld [vmem:[#allocation2 + $0x40] sm:$0xff]  ;;  %v52_v9 = vld [vmem:[#allocation2 + $0x48] sm:$0xff] }
  0x24   :  { %217 = vmatpush.msra.mxu2 %v66_v46  ;;  %175 = vmatpush.msra.mxu1 %v99_v49  ;;  %v53_v10 = vld [vmem:[#allocation2 + $0x50] sm:$0xff]  ;;  %v54_v11 = vld [vmem:[#allocation2 + $0x58] sm:$0xff]  ;;  %v55_v12 = vld [vmem:[#allocation2 + $0x60] sm:$0xff] }
  0x25   :  { %258 = vmatpush.msra.mxu3 %v98_v47  ;;  %135 = vmatpush.msra.mxu0 %v65_v52  ;;  %v56_v13 = vld [vmem:[#allocation2 + $0x68] sm:$0xff]  ;;  %v57_v14 = vld [vmem:[#allocation2 + $0x70] sm:$0xff]  ;;  %v58_v15 = vld [vmem:[#allocation2 + $0x78] sm:$0xff] }
  0x26   :  { %218 = vmatpush.msra.mxu2 %v64_v50  ;;  %176 = vmatpush.msra.mxu1 %v97_v53 }
  0x27   :  { %259 = vmatpush.msra.mxu3 %v96_v51  ;;  %136 = vmatpush.msra.mxu0 %v63_v56 }
  0x28   :  { %219 = vmatpush.msra.mxu2 %v62_v54  ;;  %177 = vmatpush.msra.mxu1 %v95_v57 }
  0x29   :  { %260 = vmatpush.msra.mxu3 %v94_v55  ;;  %137 = vmatpush.msra.mxu0 %v61_v62 }
  0x2a   :  { %220 = vmatpush.msra.mxu2 %v60_v58  ;;  %178 = vmatpush.msra.mxu1 %v93_v63 }
  0x2b   :  { %261 = vmatpush.msra.mxu3 %v92_v59  ;;  %221 = vmatmul.f32.vlgmr.msra.gmra.mxu2 %v43_v60 }
  0x2c   :  { %262 = vmatmul.f32.vlgmr.msra.gmra.mxu3 %v44_v61  ;;  %138 = vmatpush.msra.mxu0 %v59_v0 }
  0x2d   :  { %179 = vmatpush.msra.mxu1 %v91_v1  ;;  %139 = vmatmul.f32.vlgmr.msra.gmra.mxu0 %v43_v60 }
  0x2e   :  { %180 = vmatmul.f32.vlgmr.msra.gmra.mxu1 %v44_v61 }
  0x33   :  { %224 = vmatmul.f32.gmra.mxu2 %v45_v2 }
  0x34   :  { %265 = vmatmul.f32.gmra.mxu3 %v46_v3 }
  0x35   :  { %142 = vmatmul.f32.gmra.mxu0 %v45_v2 }
  0x36   :  { %183 = vmatmul.f32.gmra.mxu1 %v46_v3 }
  0x3b   :  { %227 = vmatmul.f32.gmra.mxu2 %v47_v4 }
  0x3c   :  { %268 = vmatmul.f32.gmra.mxu3 %v48_v5 }
  0x3d   :  { %145 = vmatmul.f32.gmra.mxu0 %v47_v4 }
  0x3e   :  { %186 = vmatmul.f32.gmra.mxu1 %v48_v5 }
  0x43   :  { %230 = vmatmul.f32.gmra.mxu2 %v49_v6 }
  0x44   :  { %271 = vmatmul.f32.gmra.mxu3 %v50_v7 }
  0x45   :  { %148 = vmatmul.f32.gmra.mxu0 %v49_v6 }
  0x46   :  { %189 = vmatmul.f32.gmra.mxu1 %v50_v7 }
  0x4b   :  { %233 = vmatmul.f32.gmra.mxu2 %v51_v8 }
  0x4c   :  { %274 = vmatmul.f32.gmra.mxu3 %v52_v9 }
  0x4d   :  { %151 = vmatmul.f32.gmra.mxu0 %v51_v8 }
  0x4e   :  { %192 = vmatmul.f32.gmra.mxu1 %v52_v9 }
  0x53   :  { %236 = vmatmul.f32.gmra.mxu2 %v53_v10 }
  0x54   :  { %277 = vmatmul.f32.gmra.mxu3 %v54_v11 }
  0x55   :  { %154 = vmatmul.f32.gmra.mxu0 %v53_v10 }
  0x56   :  { %195 = vmatmul.f32.gmra.mxu1 %v54_v11 }
  0x5b   :  { %239 = vmatmul.f32.gmra.mxu2 %v55_v12 }
  0x5c   :  { %280 = vmatmul.f32.gmra.mxu3 %v56_v13 }
  0x5d   :  { %157 = vmatmul.f32.gmra.mxu0 %v55_v12 }
  0x5e   :  { %198 = vmatmul.f32.gmra.mxu1 %v56_v13 }
  0x63   :  { %242 = vmatmul.f32.gmra.mxu2 %v57_v14 }
  0x64   :  { %283 = vmatmul.f32.gmra.mxu3 %v58_v15 }
  0x65   :  { %160 = vmatmul.f32.gmra.mxu0 %v57_v14 }
  0x66   :  { %201 = vmatmul.f32.gmra.mxu1 %v58_v15 }
  0xaa   :  { %v140_v16 = vpop.f32.mrf.mxu0 }
  0xab   :  { %v181_v17 = vpop.f32.mrf.mxu1 }
  0xac   :  { %v182_v18 = vadd.f32 %v181_v17, %v140_v16 }
  0xae   :  { %v222_v19 = vpop.f32.mrf.mxu2  ;;  %287 = vst [vmem:[%s440_s2] sm:$0xff] %v182_v18 }
  0xaf   :  { %v263_v20 = vpop.f32.mrf.mxu3 }
  0xb0   :  { %v264_v21 = vadd.f32 %v263_v20, %v222_v19 }
  0xb2   :  { %288 = vst [vmem:[%s440_s2 + $0x8] sm:$0xff] %v264_v21  ;;  %v143_v22 = vpop.f32.mrf.mxu0 }
  0xb3   :  { %v184_v23 = vpop.f32.mrf.mxu1 }
  0xb4   :  { %v185_v24 = vadd.f32 %v184_v23, %v143_v22 }
  0xb6   :  { %v225_v25 = vpop.f32.mrf.mxu2  ;;  %289 = vst [vmem:[%s440_s2 + $0x10] sm:$0xff] %v185_v24 }
  0xb7   :  { %v266_v26 = vpop.f32.mrf.mxu3 }
  0xb8   :  { %v267_v27 = vadd.f32 %v266_v26, %v225_v25 }
  0xba   :  { %290 = vst [vmem:[%s440_s2 + $0x18] sm:$0xff] %v267_v27  ;;  %v146_v28 = vpop.f32.mrf.mxu0 }
  0xbb   :  { %v187_v29 = vpop.f32.mrf.mxu1 }
  0xbc   :  { %v188_v30 = vadd.f32 %v187_v29, %v146_v28 }
  0xbe   :  { %v228_v31 = vpop.f32.mrf.mxu2  ;;  %291 = vst [vmem:[%s440_s2 + $0x20] sm:$0xff] %v188_v30 }
  0xbf   :  { %v269_v32 = vpop.f32.mrf.mxu3 }
  0xc0   :  { %v270_v33 = vadd.f32 %v269_v32, %v228_v31 }
  0xc2   :  { %292 = vst [vmem:[%s440_s2 + $0x28] sm:$0xff] %v270_v33  ;;  %v149_v34 = vpop.f32.mrf.mxu0 }
  0xc3   :  { %v190_v35 = vpop.f32.mrf.mxu1 }
  0xc4   :  { %v191_v36 = vadd.f32 %v190_v35, %v149_v34 }
  0xc6   :  { %v231_v37 = vpop.f32.mrf.mxu2  ;;  %293 = vst [vmem:[%s440_s2 + $0x30] sm:$0xff] %v191_v36 }
  0xc7   :  { %v272_v38 = vpop.f32.mrf.mxu3 }
  0xc8   :  { %v273_v39 = vadd.f32 %v272_v38, %v231_v37 }
  0xca   :  { %294 = vst [vmem:[%s440_s2 + $0x38] sm:$0xff] %v273_v39  ;;  %v152_v40 = vpop.f32.mrf.mxu0 }
  0xcb   :  { %v193_v41 = vpop.f32.mrf.mxu1 }
  0xcc   :  { %v194_v42 = vadd.f32 %v193_v41, %v152_v40 }
  0xce   :  { %v234_v43 = vpop.f32.mrf.mxu2  ;;  %295 = vst [vmem:[%s440_s2 + $0x40] sm:$0xff] %v194_v42 }
  0xcf   :  { %v275_v44 = vpop.f32.mrf.mxu3 }
  0xd0   :  { %v276_v45 = vadd.f32 %v275_v44, %v234_v43 }
  0xd2   :  { %296 = vst [vmem:[%s440_s2 + $0x48] sm:$0xff] %v276_v45  ;;  %v155_v46 = vpop.f32.mrf.mxu0 }
  0xd3   :  { %v196_v47 = vpop.f32.mrf.mxu1 }
  0xd4   :  { %v197_v48 = vadd.f32 %v196_v47, %v155_v46 }
  0xd6   :  { %v237_v49 = vpop.f32.mrf.mxu2  ;;  %297 = vst [vmem:[%s440_s2 + $0x50] sm:$0xff] %v197_v48 }
  0xd7   :  { %v278_v50 = vpop.f32.mrf.mxu3 }
  0xd8   :  { %v279_v51 = vadd.f32 %v278_v50, %v237_v49 }
  0xda   :  { %298 = vst [vmem:[%s440_s2 + $0x58] sm:$0xff] %v279_v51  ;;  %v158_v52 = vpop.f32.mrf.mxu0 }
  0xdb   :  { %v199_v53 = vpop.f32.mrf.mxu1 }
  0xdc   :  { %v200_v54 = vadd.f32 %v199_v53, %v158_v52 }
  0xde   :  { %v240_v55 = vpop.f32.mrf.mxu2  ;;  %299 = vst [vmem:[%s440_s2 + $0x60] sm:$0xff] %v200_v54 }
  0xdf   :  { %v281_v56 = vpop.f32.mrf.mxu3 }
  0xe0   :  { %v282_v57 = vadd.f32 %v281_v56, %v240_v55 }
  0xe2   :  { %300 = vst [vmem:[%s440_s2 + $0x68] sm:$0xff] %v282_v57  ;;  %v161_v58 = vpop.f32.mrf.mxu0 }
  0xe3   :  { %v202_v59 = vpop.f32.mrf.mxu1 }
  0xe4   :  { %v203_v60 = vadd.f32 %v202_v59, %v161_v58 }
  0xe6   :  { %v243_v61 = vpop.f32.mrf.mxu2  ;;  %301 = vst [vmem:[%s440_s2 + $0x70] sm:$0xff] %v203_v60 }
  0xe7   :  { %v284_v62 = vpop.f32.mrf.mxu3 }
  0xe8   :  { %v285_v63 = vadd.f32 %v284_v62, %v243_v61 }
  0xea   :  { %302 = vst [vmem:[%s440_s2 + $0x78] sm:$0xff] %v285_v63 }
  0xeb   :  { %307 = vsyncpa [#allocation3], 1 }
  0xec   :  { %308 = vsyncpa [#allocation5], 1 }

// kernel: memory_efficient_cross_attention_forward.6
= control target key start
LH: loop header
LB: loop body
LE: loop exit
PB: predicated region body
PF: predicated region fallthrough
CT: control target
= control target key end

     0   :  { %s1564_s0 = inlined_call_operand.vmem [shape: f32[2,32,256], index: 0, kind: input, shape index: {}]   ;;  %s1565_s1 = inlined_call_operand.vmem [shape: f32[2,16,256], index: 1, kind: input, shape index: {}]   ;;  %s1566_s2 = inlined_call_operand.vmem [shape: f32[2,16,256], index: 2, kind: input, shape index: {}]   ;;  %s1567_s3 = inlined_call_operand.vmem [shape: f32[2,32,256], index: 3, kind: output, shape index: {}]  }
   0x1   :  { %1572 = sst [smem:[#allocation9_spill]] %s1564_s0 }
   0x2   :  { %s1311_s12 = smov 0   ;;  %s1313_s13 = smov 0  }
   0x3   :  { %s1315_s14 = smov 0   ;;  %s1317_s15 = smov 0  }
   0x4   :  { %s1319_s16 = smov 0   ;;  %s1321_s17 = smov 0  }
   0x5   :  { %s1323_s18 = smov 0   ;;  %s1325_s19 = smov 0  }
   0x6   :  { %s1327_s20 = smov 0   ;;  %s1329_s21 = smov 0  }
   0x7   :  { %s1331_s22 = smov 0  }
   0x8 LB: > { %1573 = sst [smem:[#allocation4_spill]] %s1281_s21  ;;  %s28_s23 = sadd.s32 1, %s1269_s18  ;;  %s1285_s22 = sphi %s1331_s22, %s13_s22   ;;  %s1281_s21 = sphi %s1329_s21, %s1594_s21   ;;  %s1277_s20 = sphi %s1327_s20, %s1593_s20   ;;  %s1273_s19 = sphi %s1325_s19, %s1592_s19   ;;  %s1269_s18 = sphi %s1323_s18, %s1591_s18   ;;  %s1265_s17 = sphi %s1321_s17, %s1581_s17   ;;  %s1261_s16 = sphi %s1319_s16, %s1590_s16   ;;  %s1257_s15 = sphi %s1317_s15, %s1589_s15   ;;  %s1253_s14 = sphi %s1315_s14, %s1588_s14   ;;  %s1249_s13 = sphi %s1313_s13, %s1587_s13   ;;  %s1245_s12 = sphi %s1311_s12, %s1586_s12  }
   0x9   : > { %p29_p0 = scmp.ge.s32.totalorder %s28_s23, 2  ;;  %s31_s24 = sadd.s32 1, %s1273_s19 }
   0xa   : > { %s1027_s25 = sadd.s32 4294967295, %s1285_s22   ;;  %s35_s26 = sadd.s32 1, %s1277_s20 }
   0xb   : > { %s1596_s23 = smov (%p29_p0, %s28_s23), 0  ;;  %s1598_s24 = smov (!%p29_p0, %s31_s24), %s1273_s19 }
   0xc   : > { %1574 = sst [smem:[#allocation5_spill]] %s1596_s23  ;;  %p57_p1 = scmp.ne.s32.totalorder %s1249_s13, %s1245_s12 }
   0xd   : > { %p33_p2 = scmp.ge.s32.totalorder %s1598_s24, 2  ;;  %p58_p3 = scmp.eq.s32.totalorder %s1285_s22, 0 }
   0xe   : > { %p151_p4 = scmp.eq.s32.totalorder %s1027_s25, 15  ;;  %s39_s27 = sadd.s32 1, %s1281_s21 }
   0xf   : > { %s1600_s26 = smov (!%p33_p2, %s35_s26), %s1277_s20  ;;  %p1378_p5 = por %p58_p3, %p57_p1 }
  0x10   : > { %p37_p6 = scmp.ge.s32.totalorder %s1600_s26, 2  ;;  %p1382_p7 = por %p151_p4, %p57_p1 }
  0x11   : > { %s1602_s24 = smov (%p33_p2, %s1598_s24), 0  ;;  %s50_s8 = sadd.s32 1, %s1249_s13 }
  0x12   : > { %1577 = sst [smem:[#allocation6_spill]] %s1602_s24  ;;  %s1604_s27 = smov (!%p37_p6, %s39_s27), %s1281_s21 }
  0x13   : > { %s1606_s26 = smov (%p37_p6, %s1600_s26), 0  ;;  %p41_p8 = scmp.ge.s32.totalorder %s1604_s27, 2 }
  0x14   : > { %1578 = sst [smem:[#allocation7_spill]] %s1606_s26  ;;  %s44_s30 = ssub.s32 %s1273_s19, %s1602_s24 }
  0x15   : > { %s1608_s27 = smov (%p41_p8, %s1604_s27), 0  ;;  %s46_s4 = ssub.s32 %s1277_s20, %s1606_s26 }
  0x16   : > { %1579 = sst [smem:[#allocation8_spill]] %s1608_s27  ;;  %s43_s5 = ssub.s32 %s1281_s21, %s1608_s27 }
  0x17   : > { %s45_s6 = sor.u32 %s44_s30, %s43_s5  ;;  %p1030_p10 = scmp.ge.s32.totalorder %s1285_s22, 16 }
  0x18   : > { %s47_s7 = sor.u32 %s46_s4, %s45_s6 }
  0x19   : > { %p48_p9 = scmp.eq.s32.totalorder %s47_s7, 0  ;;  %173 = sbr.rel (%p1030_p10) target bundleno = 43 (0x2b), region = 16 }
  0x1b   : > { %s1401_s9 = scalar_select %p48_p9, %s1249_s13, %s50_s8  }
  0x1e   : > { %176 = sbr.rel (!%p1378_p5) target bundleno = 43 (0x2b), region = 20  ;;  %s178_s10 = sand.u32 (%p1378_p5), 1, %s1249_s13  }
  0x1f   : > { %s1073_s11 = sshll.u32 (%p1378_p5), %s1273_s19, 2  ;;  %s1031_s25 = sshll.u32 (%p1378_p5), %s178_s10, 4 }
  0x20   : > { %s183_s27 = sadd.s32 (%p1378_p5), %s1277_s20, %s1073_s11  ;;  %s1034_s30 = sshll.u32 (%p1378_p5), %s1281_s21, 3 }
  0x21   : > { %s185_s4 = sadd.s32 (%p1378_p5), %s1034_s30, %s183_s27  ;;  %s1580_s0 = sld [smem:[#allocation9_spill]] (%p1378_p5) }
  0x22   : > { %s1035_s5 = sshll.u32 (%p1378_p5), %s185_s4, 3  ;;  %s180_s26 = scalar_lea.vmem (%p1378_p5), [#allocation2], %s1031_s25 }
  0x27   : > { %s187_s8 = scalar_lea.vmem %s1580_s0, %s1035_s5 }
  0x28   : > { %v218_v0 = vld [vmem:[%s187_s8] sm:$0xff]  ;;  %v220_v1 = vld [vmem:[%s187_s8 + $0x10] sm:$0xff] }
  0x29   : > { %219 = vst [vmem:[%s180_s26] sm:$0xff] %v218_v0 }
  0x2a   : > { %221 = vst [vmem:[%s180_s26 + $0x8] sm:$0xff] %v220_v1 }
  0x2b PF: > { %p1036_p11 = scmp.ge.s32.totalorder %s1285_s22, 1  ;;  %p256_p12 = scmp.lt.s32.totalorder %s1285_s22, 17 }
  0x2d   : > { %p257_p13 = pnand %p1036_p11, %p256_p12 }
  0x2e   : > { %s263_s27 = sand.u32 (!%p257_p13), 1, %s1245_s12   ;;  %p310_p0 = scmp.lt.s32.totalorder (!%p257_p13), %s1265_s17, 1 }
  0x2f   : > { %260 = sbr.rel (%p257_p13) target bundleno = 880 (0x370), region = 66  ;;  %s1037_s28 = sshll.u32 (!%p257_p13), %s263_s27, 4 }
  0x30   : > { %p312_p1 = scmp.lt.s32.totalorder (!%p257_p13), %s1253_s14, 1  ;;  %p314_p2 = scmp.lt.s32.totalorder (!%p257_p13), %s1261_s16, 1 }
  0x31   : > { %s265_s27 = scalar_lea.vmem (!%p257_p13), [#allocation2], %s1037_s28  ;;  %s1430_s21 = scalar_lea.vmem (!%p257_p13), [#allocation3], %s1037_s28 }
  0x32   : > { %p1045_p3 = scmp.ne.s32.totalorder (!%p257_p13), %s1253_s14, 0 }
  0x34   : > { %s311_s26 = scalar_select %p310_p0, %s1265_s17, 1 }
  0x35   : > { %s313_s10 = scalar_select %p312_p1, %s1253_s14, 1 }
  0x36   : > { %s1040_s25 = sshll.u32 %s311_s26, 2 }
  0x37   : > { %s1039_s11 = sshll.u32 %s313_s10, 1 }
  0x38   : > { %s315_s30 = scalar_select %p314_p2, %s1261_s16, 1 }
  0x39   : > { %338 = sbr.rel (%p1045_p3) target bundleno = 65 (0x41), region = 74 }
  0x3a   : > { %s317_s4 = sadd.s32 %s1039_s11, %s315_s30 }
  0x3b   : > { %s319_s5 = sadd.s32 %s1040_s25, %s317_s4 }
  0x3c   : > { %s1041_s6 = sshll.u32 %s319_s5, 3 }
  0x3d   : > { %s321_s0 = scalar_lea.vmem %s1565_s1, %s1041_s6  ;;  %s1428_s12 = scalar_lea.vmem %s1566_s2, %s1041_s6 }
  0x3e   : > { %v1287_v2 = vmov 0.0  }
  0x3f   : > { %339 = vst [vmem:[%s1430_s21] sm:$0xff] %v1287_v2 }
  0x40   : > { %340 = vst [vmem:[%s1430_s21 + $0x8] sm:$0xff] %v1287_v2 }
  0x41 PF: > { %v343_v3 = vld [vmem:[%s321_s0] sm:$0xff]  ;;  %vm345_vm0 = vcmask 261120   ;;  %s1288_s26 = smov 96   ;;  %v342_v5 = vld [vmem:[%s265_s27 + $0x8] sm:$0xff]  ;;  %s1289_s14 = smov 64   ;;  %vm378_vm1 = vcmask 64512  }
  0x42   : > { %v341_v4 = vld [vmem:[%s265_s27] sm:$0xff]  ;;  %460 = vrot.lane.b32.xlu0 %v343_v3, %s1288_s26  ;;  %1046 = vmatpush.xpose.msk.msra.mxu0 %vm345_vm0, %v343_v3  ;;  %s1290_s0 = smov 32   ;;  %s1074_s23 = sshll.u32 (%p1382_p7), %s1257_s15, 2 }
  0x43   : > { %456 = vrot.lane.b32.xlu1 %v341_v4, %s1288_s26  ;;  %458 = vrot.lane.b32.xlu2 %v342_v5, %s1288_s26  ;;  %v344_v14 = vld [vmem:[%s1428_s12] sm:$0xff]  ;;  %s1069_s24 = sshll.u32 (%p1382_p7), %s1265_s17, 3  ;;  %s849_s28 = sadd.s32 (%p1382_p7), %s1261_s16, %s1074_s23 }
  0x44   : > { %418 = vmatpush.msra.mxu1 %v344_v14  ;;  %s851_s10 = sadd.s32 (%p1382_p7), %s1069_s24, %s849_s28 }
  0x45   : > { %1047 = vmatmul.msk.f32.vlgmr.msra.gmra.mxu0 %vm345_vm0, %v341_v4  ;;  %s1070_s11 = sshll.u32 (%p1382_p7), %s851_s10, 3 }
  0x46   : > { %s853_s4 = scalar_lea.vmem (%p1382_p7), %s1567_s3, %s1070_s11 }
  0x4b   : > { %576 = vrot.lane.b32.xlu2 %v343_v3, %s1289_s14 }
  0x4d   : > { %1048 = vmatmul.msk.f32.gmra.mxu0 %vm345_vm0, %v342_v5 }
  0x53   : > { %691 = vrot.lane.b32.xlu2 %v343_v3, %s1290_s0 }
  0x5b   : > { %572 = vrot.lane.b32.xlu2 %v341_v4, %s1289_s14 }
  0x63   : > { %574 = vrot.lane.b32.xlu2 %v342_v5, %s1289_s14 }
  0x9d   : > { %v459_v8 = vpop.permute.xlu2 %458 }
  0xa5   : > { %v577_v13 = vpop.permute.xlu2 %576 }
  0xa6   : > { %1056 = vmatpush.xpose.msk.msrb.mxu1 %vm345_vm0, %v577_v13 }
  0xad   : > { %v692_v15 = vpop.permute.xlu2 %691 }
  0xae   : > { %1061 = vmatpush.xpose.msk.msrb.mxu0 %vm345_vm0, %v692_v15 }
  0xb4   : > { %v461_v6 = vpop.permute.xlu0 %460 }
  0xb5   : > { %1051 = vmatpush.xpose.msk.msra.mxu2 %vm345_vm0, %v461_v6  ;;  %v457_v7 = vpop.permute.xlu1 %456  ;;  %v573_v29 = vpop.permute.xlu2 %572 }
  0xb8   : > { %1052 = vmatmul.msk.f32.vlgmr.msra.gmra.mxu2 %vm345_vm0, %v457_v7 }
  0xbd   : > { %v575_v31 = vpop.permute.xlu2 %574 }
  0xc0   : > { %1053 = vmatmul.msk.f32.gmra.mxu2 %vm345_vm0, %v459_v8 }
  0xc2   : > { %v372_v9 = vpop.f32.mrf.mxu0 }
  0xc3   : > { %v379_v10 = vsel %vm378_vm1, %v372_v9, -inf }
  0xc4   : > { %380 = vmax.xlane.f32.xlu0 %v379_v10 }
  0xca   : > { %v375_v11 = vpop.f32.mrf.mxu0 }
  0xcb   : > { %v382_v12 = vsel %vm378_vm1, %v375_v11, -inf }
  0xcc   : > { %383 = vmax.xlane.f32.xlu1 %v382_v12 }
  0xd8   : > { %687 = vrot.lane.b32.xlu0 %v341_v4, %s1290_s0 }
  0xe0   : > { %689 = vrot.lane.b32.xlu0 %v342_v5, %s1290_s0 }
  0xe5   : > { %510 = vrot.lane.b32.xlu1 %v344_v14, %s1288_s26 }
 0x137   : > { %v381_v16 = vpop.xlane.xlu0 %380 }
 0x138   : > { %v385_v17 = vsub.f32 %v372_v9, %v381_v16 }
 0x13a   : > { %v387_v18 = vmul.f32 1.442695, %v385_v17 }
 0x13b   : > { %v485_v19 = vpop.f32.mrf.mxu2 }
 0x13c   : > { %1167 = vpow2.f32 %v387_v18  ;;  %v491_v20 = vsel %vm378_vm1, %v485_v19, -inf }
 0x13d   : > { %492 = vmax.xlane.f32.xlu2 %v491_v20 }
 0x13f   : > { %v384_v21 = vpop.xlane.xlu1 %383 }
 0x140   : > { %v386_v22 = vsub.f32 %v375_v11, %v384_v21 }
 0x142   : > { %v1457_v23 = vpop.eup %1167  ;;  %v389_v24 = vmul.f32 1.442695, %v386_v22 }
 0x143   : > { %1049 = vmatmul.msk.f32.vlgmr.msra.gmra.mxu1 %vm378_vm1, %v1457_v23  ;;  %v488_v25 = vpop.f32.mrf.mxu2 }
 0x144   : > { %1169 = vpow2.f32 %v389_v24  ;;  %v494_v26 = vsel %vm378_vm1, %v488_v25, -inf }
 0x145   : > { %495 = vmax.xlane.f32.xlu0 %v494_v26  ;;  %v391_v26 = vsel %vm378_vm1, %v1457_v23, 0.0 }
 0x14a   : > { %v1170_v27 = vpop.eup %1169  ;;  %v688_v28 = vpop.permute.xlu0 %687 }
 0x14b   : > { %1050 = vmatmul.msk.f32.gmra.mxu1 %vm378_vm1, %v1170_v27  ;;  %1062 = vmatmul.msk.f32.vlgmr.msrb.gmra.mxu0 %vm345_vm0, %v688_v28  ;;  %v394_v53 = vsel %vm378_vm1, %v1170_v27, 0.0 }
 0x152   : > { %v690_v30 = vpop.permute.xlu0 %689 }
 0x153   : > { %1057 = vmatmul.msk.f32.vlgmr.msrb.gmra.mxu1 %vm345_vm0, %v573_v29  ;;  %1063 = vmatmul.msk.f32.gmra.mxu0 %vm345_vm0, %v690_v30 }
 0x157   : > { %v511_v32 = vpop.permute.xlu1 %510 }
 0x158   : > { %534 = vmatpush.msra.mxu3 %v511_v32 }
 0x15b   : > { %1058 = vmatmul.msk.f32.gmra.mxu1 %vm345_vm0, %v575_v31 }
 0x1b0   : > { %v493_v33 = vpop.xlane.xlu2 %492 }
 0x1b1   : > { %v497_v34 = vsub.f32 %v485_v19, %v493_v33 }
 0x1b3   : > { %v499_v35 = vmul.f32 1.442695, %v497_v34 }
 0x1b5   : > { %1171 = vpow2.f32 %v499_v35 }
 0x1b8   : > { %v496_v36 = vpop.xlane.xlu0 %495 }
 0x1b9   : > { %v498_v37 = vsub.f32 %v488_v25, %v496_v36 }
 0x1bb   : > { %v1172_v38 = vpop.eup %1171  ;;  %v501_v39 = vmul.f32 1.442695, %v498_v37 }
 0x1bc   : > { %1054 = vmatmul.msk.f32.vlgmr.msra.gmra.mxu3 %vm378_vm1, %v1172_v38  ;;  %v503_v52 = vsel %vm378_vm1, %v1172_v38, 0.0 }
 0x1bd   : > { %1173 = vpow2.f32 %v501_v39 }
 0x1c0   : > { %v1468_v40 = vpop.f32.mrf.mxu1 }
 0x1c3   : > { %v1174_v41 = vpop.eup %1173 }
 0x1c4   : > { %1055 = vmatmul.msk.f32.gmra.mxu3 %vm378_vm1, %v1174_v41  ;;  %v506_v50 = vsel %vm378_vm1, %v1174_v41, 0.0 }
 0x1c8   : > { %v1471_v42 = vpop.f32.mrf.mxu1  ;;  %v716_v43 = vpop.f32.mrf.mxu0 }
 0x1c9   : > { %v722_v44 = vsel %vm378_vm1, %v716_v43, -inf }
 0x1ca   : > { %723 = vmax.xlane.f32.xlu2 %v722_v44 }
 0x1d0   : > { %v601_v45 = vpop.f32.mrf.mxu1  ;;  %v719_v46 = vpop.f32.mrf.mxu0 }
 0x1d1   : > { %v725_v47 = vsel %vm378_vm1, %v719_v46, -inf  ;;  %v607_v48 = vsel %vm378_vm1, %v601_v45, -inf }
 0x1d2   : > { %726 = vmax.xlane.f32.xlu2 %v725_v47  ;;  %608 = vmax.xlane.f32.xlu1 %v607_v48 }
 0x1d8   : > { %v604_v49 = vpop.f32.mrf.mxu1 }
 0x1d9   : > { %v610_v51 = vsel %vm378_vm1, %v604_v49, -inf }
 0x1da   : > { %507 = vadd.xlane.f32.xlu1 %v506_v50  ;;  %611 = vmax.xlane.f32.xlu0 %v610_v51 }
 0x1ea   : > { %740 = vrot.lane.b32.xlu2 %v344_v14, %s1290_s0 }
 0x1ee   : > { %625 = vrot.lane.b32.xlu0 %v344_v14, %s1289_s14 }
 0x218   : > { %504 = vadd.xlane.f32.xlu0 %v503_v52 }
 0x220   : > { %395 = vadd.xlane.f32.xlu0 %v394_v53 }
 0x23d   : > { %v724_v54 = vpop.xlane.xlu2 %723 }
 0x23e   : > { %v728_v55 = vsub.f32 %v716_v43, %v724_v54 }
 0x23f   : > { %v536_v16 = vpop.f32.mrf.mxu3 }
 0x240   : > { %v730_v56 = vmul.f32 1.442695, %v728_v55 }
 0x242   : > { %1175 = vpow2.f32 %v730_v56 }
 0x245   : > { %v727_v57 = vpop.xlane.xlu2 %726  ;;  %v609_v58 = vpop.xlane.xlu1 %608 }
 0x246   : > { %v613_v59 = vsub.f32 %v601_v45, %v609_v58  ;;  %v729_v61 = vsub.f32 %v719_v46, %v727_v57 }
 0x247   : > { %v539_v25 = vpop.f32.mrf.mxu3 }
 0x248   : > { %v1176_v60 = vpop.eup %1175  ;;  %v615_v62 = vmul.f32 1.442695, %v613_v59  ;;  %v732_v0 = vmul.f32 1.442695, %v729_v61 }
 0x249   : > { %v734_v63 = vsel %vm378_vm1, %v1176_v60, 0.0 }
 0x24a   : > { %735 = vadd.xlane.f32.xlu1 %v734_v63  ;;  %1177 = vpow2.f32 %v615_v62 }
 0x24d   : > { %v741_v1 = vpop.permute.xlu2 %740  ;;  %v612_v2 = vpop.xlane.xlu0 %611 }
 0x24e   : > { %v614_v3 = vsub.f32 %v604_v49, %v612_v2  ;;  %v508_v4 = vpop.xlane.xlu1 %507  ;;  %764 = vmatpush.msrb.mxu2 %v741_v1 }
 0x24f   : > { %1179 = vrcp.f32 %v508_v4  ;;  %1064 = vmatmul.msk.f32.vlgmr.msrb.gmra.mxu2 %vm378_vm1, %v1176_v60  ;;  %v567_v17 = vand.u32 2147483648, %v508_v4  ;;  %vm561_vm3 = vweird.f32 %v508_v4  ;;  %v565_v20 = vand.u32 2147483647, %v508_v4 }
 0x250   : > { %1181 = vpow2.f32 %v732_v0  ;;  %v617_v5 = vmul.f32 1.442695, %v614_v3  ;;  %v1178_v6 = vpop.eup %1177 }
 0x251   : > { %v619_v7 = vsel %vm378_vm1, %v1178_v6, 0.0  ;;  %v568_v22 = vor.u32 1.1754944e-38, %v567_v17  ;;  %vm566_vm5 = vcmp.eq.f32.partialorder %v565_v20, 8.507059e+37 }
 0x252   : > { %1183 = vpow2.f32 %v617_v5  ;;  %620 = vadd.xlane.f32.xlu2 %v619_v7 }
 0x255   : > { %v1180_v8 = vpop.eup %1179 }
 0x256   : > { %v1182_v9 = vpop.eup %1181  ;;  %v557_v10 = vmul.f32 %v1180_v8, %v508_v4  ;;  %vm562_vm2 = vweird.f32 %v1180_v8 }
 0x257   : > { %1065 = vmatmul.msk.f32.gmra.mxu2 %vm378_vm1, %v1182_v9  ;;  %v737_v19 = vsel %vm378_vm1, %v1182_v9, 0.0  ;;  %vm563_vm4 = vmor %vm561_vm3, %vm562_vm2 }
 0x258   : > { %v1184_v11 = vpop.eup %1183  ;;  %v558_v12 = vsub.f32 1.0, %v557_v10 }
 0x259   : > { %v622_v13 = vsel %vm378_vm1, %v1184_v11, 0.0 }
 0x25a   : > { %623 = vadd.xlane.f32.xlu1 %v622_v13  ;;  %v559_v14 = vmul.f32 %v1180_v8, %v558_v12 }
 0x25c   : > { %v560_v15 = vadd.f32 %v1180_v8, %v559_v14 }
 0x25e   : > { %v564_v21 = vsel %vm563_vm4, %v1180_v8, %v560_v15 }
 0x25f   : > { %v569_v24 = vsel %vm566_vm5, %v568_v22, %v564_v21 }
 0x260   : > { %v626_v18 = vpop.permute.xlu0 %625  ;;  %v571_v27 = vmul.f32 %v569_v24, %v539_v25 }
 0x261   : > { %649 = vmatpush.msrb.mxu3 %v626_v18 }
 0x262   : > { %738 = vadd.xlane.f32.xlu1 %v737_v19  ;;  %1059 = vmatmul.msk.f32.vlgmr.msrb.gmra.mxu3 %vm378_vm1, %v1178_v6 }
 0x26a   : > { %392 = vadd.xlane.f32.xlu1 %v391_v26  ;;  %1060 = vmatmul.msk.f32.gmra.mxu3 %vm378_vm1, %v1184_v11 }
 0x26b   : > { %808 = vrot.lane.b32.xlu2 %v571_v27, %s1290_s0 }
 0x28b   : > { %v505_v28 = vpop.xlane.xlu0 %504 }
 0x28c   : > { %1185 = vrcp.f32 %v505_v28  ;;  %v553_v32 = vand.u32 2147483648, %v505_v28  ;;  %v551_v34 = vand.u32 2147483647, %v505_v28  ;;  %vm547_vm7 = vweird.f32 %v505_v28 }
 0x28e   : > { %v554_v36 = vor.u32 1.1754944e-38, %v553_v32  ;;  %vm552_vm9 = vcmp.eq.f32.partialorder %v551_v34, 8.507059e+37 }
 0x292   : > { %v1186_v29 = vpop.eup %1185 }
 0x293   : > { %v543_v30 = vmul.f32 %v1186_v29, %v505_v28  ;;  %vm548_vm6 = vweird.f32 %v1186_v29 }
 0x294   : > { %vm549_vm8 = vmor %vm547_vm7, %vm548_vm6 }
 0x295   : > { %v544_v31 = vsub.f32 1.0, %v543_v30 }
 0x297   : > { %v545_v33 = vmul.f32 %v1186_v29, %v544_v31  ;;  %v396_v31 = vpop.xlane.xlu0 %395 }
 0x299   : > { %v546_v35 = vadd.f32 %v1186_v29, %v545_v33 }
 0x29b   : > { %v550_v23 = vsel %vm549_vm8, %v1186_v29, %v546_v35 }
 0x29c   : > { %v555_v37 = vsel %vm552_vm9, %v554_v36, %v550_v23 }
 0x29d   : > { %v570_v38 = vmul.f32 %v555_v37, %v536_v16 }
 0x29f   : > { %806 = vrot.lane.b32.xlu1 %v570_v38, %s1290_s0 }
 0x2bd   : > { %v1494_v39 = vpop.xlane.xlu1 %735 }
 0x2be   : > { %vm777_vm5 = vweird.f32 %v1494_v39  ;;  %v783_v15 = vand.u32 2147483648, %v1494_v39  ;;  %v781_v18 = vand.u32 2147483647, %v1494_v39 }
 0x2c0   : > { %v784_v22 = vor.u32 1.1754944e-38, %v783_v15  ;;  %vm782_vm9 = vcmp.eq.f32.partialorder %v781_v18, 8.507059e+37 }
 0x2c5   : > { %v621_v41 = vpop.xlane.xlu2 %620 }
 0x2c6   : > { %1187 = vrcp.f32 %v621_v41  ;;  %v668_v60 = vand.u32 2147483648, %v621_v41  ;;  %vm662_vm11 = vweird.f32 %v621_v41  ;;  %v666_v62 = vand.u32 2147483647, %v621_v41 }
 0x2c7   : > { %1189 = vrcp.f32 %v1494_v39 }
 0x2c8   : > { %v669_v5 = vor.u32 1.1754944e-38, %v668_v60  ;;  %vm667_vm2 = vcmp.eq.f32.partialorder %v666_v62, 8.507059e+37 }
 0x2cc   : > { %v1188_v44 = vpop.eup %1187 }
 0x2cd   : > { %v1496_v43 = vpop.xlane.xlu1 %623  ;;  %v658_v45 = vmul.f32 %v1188_v44, %v621_v41  ;;  %v1190_v47 = vpop.eup %1189  ;;  %vm663_vm10 = vweird.f32 %v1188_v44 }
 0x2ce   : > { %1191 = vrcp.f32 %v1496_v43  ;;  %v773_v50 = vmul.f32 %v1190_v47, %v1494_v39  ;;  %vm664_vm13 = vmor %vm662_vm11, %vm663_vm10  ;;  %vm778_vm15 = vweird.f32 %v1190_v47  ;;  %v682_v17 = vand.u32 2147483648, %v1496_v43 }
 0x2cf   : > { %v659_v48 = vsub.f32 1.0, %v658_v45  ;;  %vm779_vm6 = vmor %vm777_vm5, %vm778_vm15  ;;  %vm676_vm7 = vweird.f32 %v1496_v43  ;;  %v680_v19 = vand.u32 2147483647, %v1496_v43  ;;  %vm833_vm5 = vcmask 785408  }
 0x2d0   : > { %v774_v55 = vsub.f32 1.0, %v773_v50  ;;  %v683_v24 = vor.u32 1.1754944e-38, %v682_v17 }
 0x2d1   : > { %v660_v52 = vmul.f32 %v1188_v44, %v659_v48  ;;  %vm681_vm10 = vcmp.eq.f32.partialorder %v680_v19, 8.507059e+37 }
 0x2d2   : > { %v766_v54 = vpop.f32.mrf.mxu2  ;;  %v775_v63 = vmul.f32 %v1190_v47, %v774_v55 }
 0x2d3   : > { %v661_v58 = vadd.f32 %v1188_v44, %v660_v52 }
 0x2d4   : > { %v1192_v49 = vpop.eup %1191  ;;  %v776_v7 = vadd.f32 %v1190_v47, %v775_v63  ;;  %v803_v63 = vld [vmem:[%s1430_s21 + $0x8] sm:$0xff] }
 0x2d5   : > { %v739_v46 = vpop.xlane.xlu1 %738  ;;  %v672_v51 = vmul.f32 %v1192_v49, %v1496_v43  ;;  %v665_v2 = vsel %vm664_vm13, %v1188_v44, %v661_v58  ;;  %vm677_vm4 = vweird.f32 %v1192_v49  ;;  %v451_v44 = vand.u32 2147483648, %v396_v31 }
 0x2d6   : > { %1193 = vrcp.f32 %v739_v46  ;;  %v797_v61 = vand.u32 2147483648, %v739_v46  ;;  %v795_v1 = vand.u32 2147483647, %v739_v46  ;;  %vm791_vm14 = vweird.f32 %v739_v46  ;;  %vm678_vm8 = vmor %vm676_vm7, %vm677_vm4 }
 0x2d7   : > { %v673_v57 = vsub.f32 1.0, %v672_v51  ;;  %v670_v10 = vsel %vm667_vm2, %v669_v5, %v665_v2  ;;  %v780_v20 = vsel %vm779_vm6, %v1190_v47, %v776_v7  ;;  %v452_v52 = vor.u32 1.1754944e-38, %v451_v44 }
 0x2d8   : > { %v798_v6 = vor.u32 1.1754944e-38, %v797_v61  ;;  %vm796_vm3 = vcmp.eq.f32.partialorder %v795_v1, 8.507059e+37  ;;  %v785_v25 = vsel %vm782_vm9, %v784_v22, %v780_v20  ;;  %vm830_vm4 = vcmask 523264  }
 0x2d9   : > { %v674_v3 = vmul.f32 %v1192_v49, %v673_v57  ;;  %v800_v28 = vmul.f32 %v785_v25, %v766_v54 }
 0x2da   : > { %v769_v11 = vpop.f32.mrf.mxu2 }
 0x2db   : > { %v675_v14 = vadd.f32 %v1192_v49, %v674_v3 }
 0x2dc   : > { %v1194_v53 = vpop.eup %1193 }
 0x2dd   : > { %v787_v56 = vmul.f32 %v1194_v53, %v739_v46  ;;  %vm792_vm12 = vweird.f32 %v1194_v53  ;;  %v679_v21 = vsel %vm678_vm8, %v1192_v49, %v675_v14  ;;  %v393_v30 = vpop.xlane.xlu1 %392  ;;  %v449_v46 = vand.u32 2147483647, %v396_v31 }
 0x2de   : > { %vm793_vm1 = vmor %vm791_vm14, %vm792_vm12  ;;  %v684_v27 = vsel %vm681_vm10, %v683_v24, %v679_v21  ;;  %1195 = vrcp.f32 %v393_v30  ;;  %v437_v43 = vand.u32 2147483648, %v393_v30  ;;  %vm431_vm13 = vweird.f32 %v393_v30 }
 0x2df   : > { %v788_v59 = vsub.f32 1.0, %v787_v56  ;;  %1197 = vrcp.f32 %v396_v31  ;;  %v435_v45 = vand.u32 2147483647, %v393_v30  ;;  %vm445_vm14 = vweird.f32 %v396_v31 }
 0x2e0   : > { %v438_v49 = vor.u32 1.1754944e-38, %v437_v43 }
 0x2e1   : > { %v789_v0 = vmul.f32 %v1194_v53, %v788_v59  ;;  %vm436_vm2 = vcmp.eq.f32.partialorder %v435_v45, 8.507059e+37  ;;  %v802_v59 = vld [vmem:[%s1430_s21] sm:$0xff] }
 0x2e3   : > { %v790_v4 = vadd.f32 %v1194_v53, %v789_v0 }
 0x2e4   : > { %v1196_v32 = vpop.eup %1195 }
 0x2e5   : > { %v794_v8 = vsel %vm793_vm1, %v1194_v53, %v790_v4  ;;  %v651_v9 = vpop.f32.mrf.mxu3  ;;  %v1198_v33 = vpop.eup %1197  ;;  %v427_v34 = vmul.f32 %v1196_v32, %v393_v30  ;;  %vm432_vm11 = vweird.f32 %v1196_v32 }
 0x2e6   : > { %v799_v12 = vsel %vm796_vm3, %v798_v6, %v794_v8  ;;  %v685_v13 = vmul.f32 %v670_v10, %v651_v9  ;;  %v441_v35 = vmul.f32 %v1198_v33, %v396_v31  ;;  %vm446_vm12 = vweird.f32 %v1198_v33  ;;  %vm433_vm15 = vmor %vm431_vm13, %vm432_vm11  ;;  %v809_v53 = vpop.permute.xlu2 %808 }
 0x2e7   : > { %v801_v16 = vmul.f32 %v799_v12, %v769_v11  ;;  %v428_v36 = vsub.f32 1.0, %v427_v34  ;;  %vm447_vm1 = vmor %vm445_vm14, %vm446_vm12  ;;  %vm450_vm3 = vcmp.eq.f32.partialorder %v449_v46, 8.507059e+37 }
 0x2e8   : > { %814 = vrot.lane.b32.xlu0 %v685_v13, %s1289_s14  ;;  %v442_v23 = vsub.f32 1.0, %v441_v35 }
 0x2e9   : > { %824 = vrot.lane.b32.xlu2 %v801_v16, %s1288_s26  ;;  %v429_v37 = vmul.f32 %v1196_v32, %v428_v36 }
 0x2ea   : > { %v443_v38 = vmul.f32 %v1198_v33, %v442_v23 }
 0x2eb   : > { %v430_v39 = vadd.f32 %v1196_v32, %v429_v37 }
 0x2ec   : > { %v444_v41 = vadd.f32 %v1198_v33, %v443_v38 }
 0x2ed   : > { %v654_v26 = vpop.f32.mrf.mxu3  ;;  %v434_v47 = vsel %vm433_vm15, %v1196_v32, %v430_v39 }
 0x2ee   : > { %v686_v29 = vmul.f32 %v684_v27, %v654_v26  ;;  %v448_v48 = vsel %vm447_vm1, %v1198_v33, %v444_v41  ;;  %v439_v54 = vsel %vm436_vm2, %v438_v49, %v434_v47 }
 0x2ef   : > { %v453_v55 = vsel %vm450_vm3, %v452_v52, %v448_v48  ;;  %v454_v56 = vmul.f32 %v439_v54, %v1468_v40 }
 0x2f0   : > { %822 = vrot.lane.b32.xlu0 %v800_v28, %s1288_s26  ;;  %816 = vrot.lane.b32.xlu1 %v686_v29, %s1289_s14  ;;  %v455_v57 = vmul.f32 %v453_v55, %v1471_v42 }
 0x2f2   : > { %v829_v60 = vsel %vm345_vm0, %v455_v57, %v809_v53 }
 0x311   : > { %v807_v50 = vpop.permute.xlu1 %806 }
 0x312   : > { %v828_v58 = vsel %vm345_vm0, %v454_v56, %v807_v50 }
 0x343   : > { %v825_v1 = vpop.permute.xlu2 %824 }
 0x35a   : > { %v815_v51 = vpop.permute.xlu0 %814 }
 0x35b   : > { %v831_v61 = vsel %vm830_vm4, %v828_v58, %v815_v51 }
 0x362   : > { %v823_v62 = vpop.permute.xlu0 %822  ;;  %v817_v0 = vpop.permute.xlu1 %816 }
 0x363   : > { %v834_v2 = vsel %vm833_vm5, %v831_v61, %v823_v62  ;;  %v832_v3 = vsel %vm830_vm4, %v829_v60, %v817_v0  ;;  %846 = sbr.rel (!%p1382_p7) target bundleno = 880 (0x370), region = 78 }
 0x364   : > { %v836_v4 = vadd.f32 %v834_v2, %v802_v59  ;;  %v835_v40 = vsel %vm833_vm5, %v832_v3, %v825_v1 }
 0x365   : > { %v837_v5 = vadd.f32 %v835_v40, %v803_v63 }
 0x366   : > { %838 = vst [vmem:[%s1430_s21] sm:$0xff] %v836_v4 }
 0x367   : > { %839 = vst [vmem:[%s1430_s21 + $0x8] sm:$0xff] %v837_v5 }
 0x36d   : > { %v884_v42 = vld [vmem:[%s1430_s21] sm:$0xff] }
 0x36e   : > { %v886_v6 = vld [vmem:[%s1430_s21 + $0x8] sm:$0xff]  ;;  %885 = vst [vmem:[%s853_s4] sm:$0xff] %v884_v42 }
 0x36f   : > { %887 = vst [vmem:[%s853_s4 + $0x10] sm:$0xff] %v886_v6 }
 0x370 PF: > { %s13_s22 = sadd.s32 1, %s1285_s22   ;;  %s1581_s17 = sld [smem:[#allocation4_spill]] }
 0x371   : > { %p10_p4 = scmp.ge.s32.totalorder %s13_s22, 18   ;;  %s1582_s29 = sld [smem:[#allocation5_spill]] }
 0x372   : > { %s1583_s5 = sld [smem:[#allocation6_spill]]  ;;  %s1586_s12 = smov %s1249_s13 }
 0x373   : > { %s1584_s21 = sld [smem:[#allocation7_spill]]  ;;  %s1587_s13 = smov %s1401_s9 }
 0x374   : > { %s1585_s6 = sld [smem:[#allocation8_spill]]  ;;  %s1588_s14 = smov %s1269_s18 }
 0x375   : > { %s1589_s15 = smov %s1273_s19  ;;  %s1590_s16 = smov %s1277_s20 }
 0x376   :  { %12 = sbr.rel (!%p10_p4) target bundleno = 8 (0x8), region = 153 }
 0x377   : > { %s1591_s18 = smov %s1582_s29 }
 0x378   : > { %s1592_s19 = smov %s1583_s5 }
 0x379   : > { %s1593_s20 = smov %s1584_s21 }
 0x37a   : > { %s1594_s21 = smov %s1585_s6 }

// kernel: memory_efficient_cross_attention_forward.7
= control target key start
LH: loop header
LB: loop body
LE: loop exit
PB: predicated region body
PF: predicated region fallthrough
CT: control target
= control target key end

     0   :  { %8 = vsyncpa [#allocation3], 0  ;;  %s479_s0 = inlined_call_operand.vmem [shape: f32[64,256], index: 0, kind: input, shape index: {}]   ;;  %s480_s1 = inlined_call_operand.hbm [shape: f32[256,256], index: 1, kind: input, shape index: {}]   ;;  %s481_s2 = inlined_call_operand.vmem [shape: f32[1,256], index: 2, kind: input, shape index: {}]   ;;  %s482_s3 = inlined_call_operand.hbm [shape: f32[64,256], index: 3, kind: output, shape index: {}]  }
   0x1   :  { %9 = vsyncpa [#allocation4], 0  ;;  %s16_s14 = sshll.u32 %s480_s1, 4  ;;  %s372_s15 = smov [#allocation2]   ;;  %s17_s14 = int_to_ptr.hbm [resolvable:$true] %s16_s14 }
   0x2   :  { %s18_s16 = sshll.u32 %s372_s15, 4  ;;  %s373_s17 = smov 256   ;;  %s19_s16 = int_to_ptr.vmem [resolvable:$true] %s18_s16 }
   0x3   :  { %s374_s18 = smov 16  }
   0x4   :  { %24 = dma.hbm_to_vmem [thread:$0]  %s17_s14, 8192, %s19_s16, [#allocation3], %s373_s17, %s373_s17, %s374_s18  }
   0x5   :  { %368 = dma.done.wait [#allocation3], 8192  }
   0x6   :  { %369 = vsyncadd [#allocation3], 4294959104  ;;  %v78_v0 = vld [vmem:[#allocation2 + $0xf8] sm:$0xff]  ;;  %v76_v1 = vld [vmem:[#allocation2 + $0xe8] sm:$0xff]  ;;  %s303_s28 = sshll.u32 %s482_s3, 4  ;;  %s304_s28 = int_to_ptr.hbm [resolvable:$true] %s303_s28 }
   0x7   :  { %v110_v2 = vld [vmem:[#allocation2 + $0x1f8] sm:$0xff]  ;;  %199 = vmatpush.msra.mxu2 %v78_v0  ;;  %v108_v3 = vld [vmem:[#allocation2 + $0x1e8] sm:$0xff]  ;;  %v77_v4 = vld [vmem:[#allocation2 + $0xf0] sm:$0xff] }
   0x8   :  { %240 = vmatpush.msra.mxu3 %v110_v2  ;;  %v74_v5 = vld [vmem:[#allocation2 + $0xd8] sm:$0xff]  ;;  %117 = vmatpush.msra.mxu0 %v77_v4  ;;  %v75_v7 = vld [vmem:[#allocation2 + $0xe0] sm:$0xff]  ;;  %v72_v8 = vld [vmem:[#allocation2 + $0xc8] sm:$0xff] }
   0x9   :  { %v106_v6 = vld [vmem:[#allocation2 + $0x1d8] sm:$0xff]  ;;  %200 = vmatpush.msra.mxu2 %v76_v1  ;;  %v109_v9 = vld [vmem:[#allocation2 + $0x1f0] sm:$0xff]  ;;  %v104_v10 = vld [vmem:[#allocation2 + $0x1c8] sm:$0xff] }
   0xa   :  { %241 = vmatpush.msra.mxu3 %v108_v3  ;;  %118 = vmatpush.msra.mxu0 %v75_v7  ;;  %v73_v11 = vld [vmem:[#allocation2 + $0xd0] sm:$0xff]  ;;  %v107_v12 = vld [vmem:[#allocation2 + $0x1e0] sm:$0xff]  ;;  %v70_v15 = vld [vmem:[#allocation2 + $0xb8] sm:$0xff] }
   0xb   :  { %158 = vmatpush.msra.mxu1 %v109_v9  ;;  %201 = vmatpush.msra.mxu2 %v74_v5  ;;  %v71_v13 = vld [vmem:[#allocation2 + $0xc0] sm:$0xff]  ;;  %v105_v14 = vld [vmem:[#allocation2 + $0x1d0] sm:$0xff]  ;;  %v102_v16 = vld [vmem:[#allocation2 + $0x1b8] sm:$0xff] }
   0xc   :  { %242 = vmatpush.msra.mxu3 %v106_v6  ;;  %119 = vmatpush.msra.mxu0 %v73_v11  ;;  %v69_v17 = vld [vmem:[#allocation2 + $0xb0] sm:$0xff]  ;;  %v103_v18 = vld [vmem:[#allocation2 + $0x1c0] sm:$0xff]  ;;  %v68_v19 = vld [vmem:[#allocation2 + $0xa8] sm:$0xff] }
   0xd   :  { %159 = vmatpush.msra.mxu1 %v107_v12  ;;  %202 = vmatpush.msra.mxu2 %v72_v8  ;;  %v100_v20 = vld [vmem:[#allocation2 + $0x1a8] sm:$0xff]  ;;  %v67_v21 = vld [vmem:[#allocation2 + $0xa0] sm:$0xff]  ;;  %v101_v22 = vld [vmem:[#allocation2 + $0x1b0] sm:$0xff] }
   0xe   :  { %243 = vmatpush.msra.mxu3 %v104_v10  ;;  %120 = vmatpush.msra.mxu0 %v71_v13  ;;  %v66_v23 = vld [vmem:[#allocation2 + $0x98] sm:$0xff]  ;;  %v65_v25 = vld [vmem:[#allocation2 + $0x90] sm:$0xff]  ;;  %v99_v26 = vld [vmem:[#allocation2 + $0x1a0] sm:$0xff] }
   0xf   :  { %160 = vmatpush.msra.mxu1 %v105_v14  ;;  %203 = vmatpush.msra.mxu2 %v70_v15  ;;  %v98_v24 = vld [vmem:[#allocation2 + $0x198] sm:$0xff]  ;;  %v64_v27 = vld [vmem:[#allocation2 + $0x88] sm:$0xff]  ;;  %v63_v29 = vld [vmem:[#allocation2 + $0x80] sm:$0xff] }
  0x10   :  { %244 = vmatpush.msra.mxu3 %v102_v16  ;;  %121 = vmatpush.msra.mxu0 %v69_v17  ;;  %v96_v28 = vld [vmem:[#allocation2 + $0x188] sm:$0xff]  ;;  %v97_v30 = vld [vmem:[#allocation2 + $0x190] sm:$0xff]  ;;  %v62_v31 = vld [vmem:[#allocation2 + $0x78] sm:$0xff] }
  0x11   :  { %161 = vmatpush.msra.mxu1 %v103_v18  ;;  %204 = vmatpush.msra.mxu2 %v68_v19  ;;  %v94_v32 = vld [vmem:[#allocation2 + $0x178] sm:$0xff]  ;;  %v61_v33 = vld [vmem:[#allocation2 + $0x70] sm:$0xff]  ;;  %v95_v34 = vld [vmem:[#allocation2 + $0x180] sm:$0xff] }
  0x12   :  { %245 = vmatpush.msra.mxu3 %v100_v20  ;;  %122 = vmatpush.msra.mxu0 %v67_v21  ;;  %v60_v35 = vld [vmem:[#allocation2 + $0x68] sm:$0xff]  ;;  %v59_v37 = vld [vmem:[#allocation2 + $0x60] sm:$0xff]  ;;  %v93_v38 = vld [vmem:[#allocation2 + $0x170] sm:$0xff] }
  0x13   :  { %162 = vmatpush.msra.mxu1 %v101_v22  ;;  %205 = vmatpush.msra.mxu2 %v66_v23  ;;  %v92_v36 = vld [vmem:[#allocation2 + $0x168] sm:$0xff]  ;;  %v58_v39 = vld [vmem:[#allocation2 + $0x58] sm:$0xff]  ;;  %v57_v41 = vld [vmem:[#allocation2 + $0x50] sm:$0xff] }
  0x14   :  { %246 = vmatpush.msra.mxu3 %v98_v24  ;;  %123 = vmatpush.msra.mxu0 %v65_v25  ;;  %v90_v40 = vld [vmem:[#allocation2 + $0x158] sm:$0xff]  ;;  %v91_v42 = vld [vmem:[#allocation2 + $0x160] sm:$0xff]  ;;  %v56_v43 = vld [vmem:[#allocation2 + $0x48] sm:$0xff] }
  0x15   :  { %163 = vmatpush.msra.mxu1 %v99_v26  ;;  %206 = vmatpush.msra.mxu2 %v64_v27  ;;  %v88_v44 = vld [vmem:[#allocation2 + $0x148] sm:$0xff]  ;;  %v55_v45 = vld [vmem:[#allocation2 + $0x40] sm:$0xff]  ;;  %v89_v46 = vld [vmem:[#allocation2 + $0x150] sm:$0xff] }
  0x16   :  { %247 = vmatpush.msra.mxu3 %v96_v28  ;;  %124 = vmatpush.msra.mxu0 %v63_v29  ;;  %v54_v47 = vld [vmem:[#allocation2 + $0x38] sm:$0xff]  ;;  %v53_v49 = vld [vmem:[#allocation2 + $0x30] sm:$0xff]  ;;  %v87_v50 = vld [vmem:[#allocation2 + $0x140] sm:$0xff] }
  0x17   :  { %164 = vmatpush.msra.mxu1 %v97_v30  ;;  %207 = vmatpush.msra.mxu2 %v62_v31  ;;  %v86_v48 = vld [vmem:[#allocation2 + $0x138] sm:$0xff]  ;;  %v52_v51 = vld [vmem:[#allocation2 + $0x28] sm:$0xff]  ;;  %v51_v53 = vld [vmem:[#allocation2 + $0x20] sm:$0xff] }
  0x18   :  { %248 = vmatpush.msra.mxu3 %v94_v32  ;;  %125 = vmatpush.msra.mxu0 %v61_v33  ;;  %v84_v52 = vld [vmem:[#allocation2 + $0x128] sm:$0xff]  ;;  %v85_v54 = vld [vmem:[#allocation2 + $0x130] sm:$0xff]  ;;  %v50_v55 = vld [vmem:[#allocation2 + $0x18] sm:$0xff] }
  0x19   :  { %165 = vmatpush.msra.mxu1 %v95_v34  ;;  %208 = vmatpush.msra.mxu2 %v60_v35  ;;  %v82_v56 = vld [vmem:[#allocation2 + $0x118] sm:$0xff]  ;;  %v49_v57 = vld [vmem:[#allocation2 + $0x10] sm:$0xff]  ;;  %v83_v58 = vld [vmem:[#allocation2 + $0x120] sm:$0xff] }
  0x1a   :  { %249 = vmatpush.msra.mxu3 %v92_v36  ;;  %126 = vmatpush.msra.mxu0 %v59_v37  ;;  %v48_v59 = vld [vmem:[#allocation2 + $0x8] sm:$0xff]  ;;  %v31_v61 = vld [vmem:[%s479_s0] sm:$0xff]  ;;  %v81_v0 = vld [vmem:[#allocation2 + $0x110] sm:$0xff] }
  0x1b   :  { %166 = vmatpush.msra.mxu1 %v93_v38  ;;  %209 = vmatpush.msra.mxu2 %v58_v39  ;;  %v80_v60 = vld [vmem:[#allocation2 + $0x108] sm:$0xff]  ;;  %v47_v63 = vld [vmem:[#allocation2] sm:$0xff]  ;;  %v33_v2 = vld [vmem:[%s479_s0 + $0x10] sm:$0xff] }
  0x1c   :  { %250 = vmatpush.msra.mxu3 %v90_v40  ;;  %127 = vmatpush.msra.mxu0 %v57_v41  ;;  %v32_v62 = vld [vmem:[%s479_s0 + $0x8] sm:$0xff]  ;;  %v79_v1 = vld [vmem:[#allocation2 + $0x100] sm:$0xff]  ;;  %v34_v3 = vld [vmem:[%s479_s0 + $0x18] sm:$0xff] }
  0x1d   :  { %167 = vmatpush.msra.mxu1 %v91_v42  ;;  %210 = vmatpush.msra.mxu2 %v56_v43  ;;  %v35_v4 = vld [vmem:[%s479_s0 + $0x20] sm:$0xff]  ;;  %v36_v5 = vld [vmem:[%s479_s0 + $0x28] sm:$0xff]  ;;  %v37_v6 = vld [vmem:[%s479_s0 + $0x30] sm:$0xff] }
  0x1e   :  { %251 = vmatpush.msra.mxu3 %v88_v44  ;;  %128 = vmatpush.msra.mxu0 %v55_v45  ;;  %v38_v7 = vld [vmem:[%s479_s0 + $0x38] sm:$0xff]  ;;  %v39_v8 = vld [vmem:[%s479_s0 + $0x40] sm:$0xff]  ;;  %v40_v9 = vld [vmem:[%s479_s0 + $0x48] sm:$0xff] }
  0x1f   :  { %168 = vmatpush.msra.mxu1 %v89_v46  ;;  %211 = vmatpush.msra.mxu2 %v54_v47  ;;  %v41_v10 = vld [vmem:[%s479_s0 + $0x50] sm:$0xff]  ;;  %v42_v11 = vld [vmem:[%s479_s0 + $0x58] sm:$0xff]  ;;  %v43_v12 = vld [vmem:[%s479_s0 + $0x60] sm:$0xff] }
  0x20   :  { %252 = vmatpush.msra.mxu3 %v86_v48  ;;  %129 = vmatpush.msra.mxu0 %v53_v49  ;;  %v44_v13 = vld [vmem:[%s479_s0 + $0x68] sm:$0xff]  ;;  %v45_v14 = vld [vmem:[%s479_s0 + $0x70] sm:$0xff]  ;;  %v46_v15 = vld [vmem:[%s479_s0 + $0x78] sm:$0xff]  ;;  %s375_s0 = smov [#allocation5]  }
  0x21   :  { %169 = vmatpush.msra.mxu1 %v87_v50  ;;  %212 = vmatpush.msra.mxu2 %v52_v51  ;;  %v111_v16 = vld [vmem:[%s481_s2] sm:$0x3]  ;;  %s301_s2 = sshll.u32 %s375_s0, 4  ;;  %s302_s2 = int_to_ptr.vmem [resolvable:$true] %s301_s2 }
  0x22   :  { %253 = vmatpush.msra.mxu3 %v84_v52  ;;  %130 = vmatpush.msra.mxu0 %v51_v53  ;;  %v453_v17 = vperm.slane %v111_v16, 0  ;;  %v456_v20 = vperm.slane %v111_v16, 1 }
  0x23   :  { %170 = vmatpush.msra.mxu1 %v85_v54  ;;  %213 = vmatpush.msra.mxu2 %v50_v55 }
  0x24   :  { %254 = vmatpush.msra.mxu3 %v82_v56  ;;  %131 = vmatpush.msra.mxu0 %v49_v57 }
  0x25   :  { %171 = vmatpush.msra.mxu1 %v83_v58  ;;  %214 = vmatpush.msra.mxu2 %v48_v59 }
  0x26   :  { %255 = vmatpush.msra.mxu3 %v80_v60  ;;  %215 = vmatmul.f32.vlgmr.msra.gmra.mxu2 %v31_v61 }
  0x27   :  { %256 = vmatmul.f32.vlgmr.msra.gmra.mxu3 %v32_v62  ;;  %132 = vmatpush.msra.mxu0 %v47_v63 }
  0x28   :  { %172 = vmatpush.msra.mxu1 %v81_v0  ;;  %133 = vmatmul.f32.vlgmr.msra.gmra.mxu0 %v31_v61 }
  0x2a   :  { %173 = vmatpush.msra.mxu1 %v79_v1 }
  0x2b   :  { %174 = vmatmul.f32.vlgmr.msra.gmra.mxu1 %v32_v62 }
  0x2e   :  { %218 = vmatmul.f32.gmra.mxu2 %v33_v2 }
  0x2f   :  { %259 = vmatmul.f32.gmra.mxu3 %v34_v3 }
  0x30   :  { %136 = vmatmul.f32.gmra.mxu0 %v33_v2 }
  0x33   :  { %177 = vmatmul.f32.gmra.mxu1 %v34_v3 }
  0x36   :  { %221 = vmatmul.f32.gmra.mxu2 %v35_v4 }
  0x37   :  { %262 = vmatmul.f32.gmra.mxu3 %v36_v5 }
  0x38   :  { %139 = vmatmul.f32.gmra.mxu0 %v35_v4 }
  0x3b   :  { %180 = vmatmul.f32.gmra.mxu1 %v36_v5 }
  0x3e   :  { %224 = vmatmul.f32.gmra.mxu2 %v37_v6 }
  0x3f   :  { %265 = vmatmul.f32.gmra.mxu3 %v38_v7 }
  0x40   :  { %142 = vmatmul.f32.gmra.mxu0 %v37_v6 }
  0x43   :  { %183 = vmatmul.f32.gmra.mxu1 %v38_v7 }
  0x46   :  { %227 = vmatmul.f32.gmra.mxu2 %v39_v8 }
  0x47   :  { %268 = vmatmul.f32.gmra.mxu3 %v40_v9 }
  0x48   :  { %145 = vmatmul.f32.gmra.mxu0 %v39_v8 }
  0x4b   :  { %186 = vmatmul.f32.gmra.mxu1 %v40_v9 }
  0x4e   :  { %230 = vmatmul.f32.gmra.mxu2 %v41_v10 }
  0x4f   :  { %271 = vmatmul.f32.gmra.mxu3 %v42_v11 }
  0x50   :  { %148 = vmatmul.f32.gmra.mxu0 %v41_v10 }
  0x53   :  { %189 = vmatmul.f32.gmra.mxu1 %v42_v11 }
  0x56   :  { %233 = vmatmul.f32.gmra.mxu2 %v43_v12 }
  0x57   :  { %274 = vmatmul.f32.gmra.mxu3 %v44_v13 }
  0x58   :  { %151 = vmatmul.f32.gmra.mxu0 %v43_v12 }
  0x5b   :  { %192 = vmatmul.f32.gmra.mxu1 %v44_v13 }
  0x5e   :  { %236 = vmatmul.f32.gmra.mxu2 %v45_v14 }
  0x5f   :  { %277 = vmatmul.f32.gmra.mxu3 %v46_v15 }
  0x60   :  { %154 = vmatmul.f32.gmra.mxu0 %v45_v14 }
  0x63   :  { %195 = vmatmul.f32.gmra.mxu1 %v46_v15 }
  0xa5   :  { %v134_v18 = vpop.f32.mrf.mxu0 }
  0xa6   :  { %v135_v19 = vadd.f32 %v134_v18, %v453_v17 }
  0xa8   :  { %v175_v21 = vpop.f32.mrf.mxu1 }
  0xa9   :  { %v176_v22 = vadd.f32 %v175_v21, %v135_v19  ;;  %v216_v23 = vpop.f32.mrf.mxu2 }
  0xaa   :  { %v257_v24 = vpop.f32.mrf.mxu3  ;;  %v217_v25 = vadd.f32 %v216_v23, %v456_v20 }
  0xab   :  { %281 = vst [vmem:[#allocation5] sm:$0xff] %v176_v22 }
  0xac   :  { %v258_v26 = vadd.f32 %v257_v24, %v217_v25 }
  0xad   :  { %v137_v27 = vpop.f32.mrf.mxu0 }
  0xae   :  { %282 = vst [vmem:[#allocation5 + $0x8] sm:$0xff] %v258_v26  ;;  %v138_v28 = vadd.f32 %v137_v27, %v453_v17 }
  0xb0   :  { %v178_v29 = vpop.f32.mrf.mxu1 }
  0xb1   :  { %v179_v30 = vadd.f32 %v178_v29, %v138_v28  ;;  %v219_v31 = vpop.f32.mrf.mxu2 }
  0xb2   :  { %v260_v32 = vpop.f32.mrf.mxu3  ;;  %v220_v33 = vadd.f32 %v219_v31, %v456_v20 }
  0xb3   :  { %283 = vst [vmem:[#allocation5 + $0x10] sm:$0xff] %v179_v30 }
  0xb4   :  { %v261_v34 = vadd.f32 %v260_v32, %v220_v33 }
  0xb5   :  { %v140_v35 = vpop.f32.mrf.mxu0 }
  0xb6   :  { %284 = vst [vmem:[#allocation5 + $0x18] sm:$0xff] %v261_v34  ;;  %v141_v36 = vadd.f32 %v140_v35, %v453_v17 }
  0xb8   :  { %v181_v37 = vpop.f32.mrf.mxu1 }
  0xb9   :  { %v182_v38 = vadd.f32 %v181_v37, %v141_v36  ;;  %v222_v39 = vpop.f32.mrf.mxu2 }
  0xba   :  { %v263_v40 = vpop.f32.mrf.mxu3  ;;  %v223_v41 = vadd.f32 %v222_v39, %v456_v20 }
  0xbb   :  { %285 = vst [vmem:[#allocation5 + $0x20] sm:$0xff] %v182_v38 }
  0xbc   :  { %v264_v42 = vadd.f32 %v263_v40, %v223_v41 }
  0xbd   :  { %v143_v43 = vpop.f32.mrf.mxu0 }
  0xbe   :  { %286 = vst [vmem:[#allocation5 + $0x28] sm:$0xff] %v264_v42  ;;  %v144_v44 = vadd.f32 %v143_v43, %v453_v17 }
  0xc0   :  { %v184_v45 = vpop.f32.mrf.mxu1 }
  0xc1   :  { %v185_v46 = vadd.f32 %v184_v45, %v144_v44  ;;  %v225_v47 = vpop.f32.mrf.mxu2 }
  0xc2   :  { %v266_v48 = vpop.f32.mrf.mxu3  ;;  %v226_v49 = vadd.f32 %v225_v47, %v456_v20 }
  0xc3   :  { %287 = vst [vmem:[#allocation5 + $0x30] sm:$0xff] %v185_v46 }
  0xc4   :  { %v267_v50 = vadd.f32 %v266_v48, %v226_v49 }
  0xc5   :  { %v146_v51 = vpop.f32.mrf.mxu0 }
  0xc6   :  { %288 = vst [vmem:[#allocation5 + $0x38] sm:$0xff] %v267_v50  ;;  %v147_v52 = vadd.f32 %v146_v51, %v453_v17 }
  0xc8   :  { %v187_v53 = vpop.f32.mrf.mxu1 }
  0xc9   :  { %v188_v54 = vadd.f32 %v187_v53, %v147_v52  ;;  %v228_v55 = vpop.f32.mrf.mxu2 }
  0xca   :  { %v269_v56 = vpop.f32.mrf.mxu3  ;;  %v229_v57 = vadd.f32 %v228_v55, %v456_v20 }
  0xcb   :  { %289 = vst [vmem:[#allocation5 + $0x40] sm:$0xff] %v188_v54 }
  0xcc   :  { %v270_v58 = vadd.f32 %v269_v56, %v229_v57 }
  0xcd   :  { %v149_v59 = vpop.f32.mrf.mxu0 }
  0xce   :  { %290 = vst [vmem:[#allocation5 + $0x48] sm:$0xff] %v270_v58  ;;  %v150_v60 = vadd.f32 %v149_v59, %v453_v17 }
  0xd0   :  { %v190_v61 = vpop.f32.mrf.mxu1 }
  0xd1   :  { %v191_v62 = vadd.f32 %v190_v61, %v150_v60  ;;  %v231_v63 = vpop.f32.mrf.mxu2 }
  0xd2   :  { %v272_v0 = vpop.f32.mrf.mxu3  ;;  %v232_v1 = vadd.f32 %v231_v63, %v456_v20 }
  0xd3   :  { %291 = vst [vmem:[#allocation5 + $0x50] sm:$0xff] %v191_v62 }
  0xd4   :  { %v273_v2 = vadd.f32 %v272_v0, %v232_v1 }
  0xd5   :  { %v152_v3 = vpop.f32.mrf.mxu0 }
  0xd6   :  { %292 = vst [vmem:[#allocation5 + $0x58] sm:$0xff] %v273_v2  ;;  %v153_v4 = vadd.f32 %v152_v3, %v453_v17 }
  0xd8   :  { %v193_v5 = vpop.f32.mrf.mxu1 }
  0xd9   :  { %v194_v6 = vadd.f32 %v193_v5, %v153_v4  ;;  %v234_v7 = vpop.f32.mrf.mxu2 }
  0xda   :  { %v275_v8 = vpop.f32.mrf.mxu3  ;;  %v235_v9 = vadd.f32 %v234_v7, %v456_v20 }
  0xdb   :  { %293 = vst [vmem:[#allocation5 + $0x60] sm:$0xff] %v194_v6 }
  0xdc   :  { %v276_v10 = vadd.f32 %v275_v8, %v235_v9 }
  0xdd   :  { %v155_v11 = vpop.f32.mrf.mxu0 }
  0xde   :  { %294 = vst [vmem:[#allocation5 + $0x68] sm:$0xff] %v276_v10  ;;  %v156_v12 = vadd.f32 %v155_v11, %v453_v17 }
  0xe0   :  { %v196_v13 = vpop.f32.mrf.mxu1 }
  0xe1   :  { %v197_v14 = vadd.f32 %v196_v13, %v156_v12  ;;  %v237_v15 = vpop.f32.mrf.mxu2 }
  0xe2   :  { %v278_v16 = vpop.f32.mrf.mxu3  ;;  %v238_v18 = vadd.f32 %v237_v15, %v456_v20 }
  0xe3   :  { %295 = vst [vmem:[#allocation5 + $0x70] sm:$0xff] %v197_v14 }
  0xe4   :  { %v279_v19 = vadd.f32 %v278_v16, %v238_v18 }
  0xe6   :  { %296 = vst [vmem:[#allocation5 + $0x78] sm:$0xff] %v279_v19 }
  0xe7   :  { %309 = dma.vmem_to_hbm [thread:$0]  %s302_s2, 2048, %s304_s28, [#allocation4], %s373_s17, %s373_s17, %s374_s18  }
  0xe8   :  { %370 = dma.done.wait [#allocation4], 2048  }
  0xe9   :  { %371 = vsyncadd [#allocation4], 4294965248 }
  0xea   :  { %314 = vsyncpa [#allocation3], 1 }
  0xeb   :  { %315 = vsyncpa [#allocation4], 1 }

// kernel: memory_efficient_cross_attention_forward.5
= control target key start
LH: loop header
LB: loop body
LE: loop exit
PB: predicated region body
PF: predicated region fallthrough
CT: control target
= control target key end

     0   :  { %10 = vsyncpa [#allocation3], 0  ;;  %s673_s0 = inlined_call_operand.hbm [shape: f32[32,256], index: 0, kind: input, shape index: {}]   ;;  %s674_s1 = inlined_call_operand.hbm [shape: f32[256,256], index: 1, kind: input, shape index: {}]   ;;  %s675_s2 = inlined_call_operand.hbm [shape: f32[256,256], index: 2, kind: input, shape index: {}]   ;;  %s676_s3 = inlined_call_operand.vmem [shape: f32[32,256], index: 3, kind: output, shape index: {0}]   ;;  %s677_s4 = inlined_call_operand.vmem [shape: f32[32,256], index: 4, kind: output, shape index: {1}]  }
   0x1   :  { %11 = vsyncpa [#allocation5], 0  ;;  %s29_s17 = sshll.u32 %s674_s1, 4  ;;  %s538_s18 = smov [#allocation4]   ;;  %s30_s17 = int_to_ptr.hbm [resolvable:$true] %s29_s17 }
   0x2   :  { %s31_s19 = sshll.u32 %s538_s18, 4  ;;  %s16_s22 = sshll.u32 %s673_s0, 4  ;;  %s32_s19 = int_to_ptr.vmem [resolvable:$true] %s31_s19  ;;  %s17_s22 = int_to_ptr.hbm [resolvable:$true] %s16_s22 }
   0x3   :  { %s539_s23 = smov 256   ;;  %s540_s24 = smov 16  }
   0x4   :  { %37 = dma.hbm_to_vmem [thread:$0]  %s30_s17, 8192, %s32_s19, [#allocation5], %s539_s23, %s539_s23, %s540_s24  }
   0x5   :  { %s541_s25 = smov [#allocation2]   ;;  %s42_s29 = sshll.u32 %s675_s2, 4  ;;  %s43_s29 = int_to_ptr.hbm [resolvable:$true] %s42_s29 }
   0x6   :  { %s18_s26 = sshll.u32 %s541_s25, 4  ;;  %s542_s1 = smov [#allocation6]   ;;  %s19_s26 = int_to_ptr.vmem [resolvable:$true] %s18_s26 }
   0x7   :  { %24 = dma.hbm_to_vmem [thread:$0]  %s17_s22, 1024, %s19_s26, [#allocation3], %s539_s23, %s539_s23, %s540_s24  }
   0x8   :  { %s44_s30 = sshll.u32 %s542_s1, 4  ;;  %s45_s30 = int_to_ptr.vmem [resolvable:$true] %s44_s30 }
   0x9   :  { %50 = dma.hbm_to_vmem [thread:$0]  %s43_s29, 8192, %s45_s30, [#allocation5], %s539_s23, %s539_s23, %s540_s24  }
   0xa   :  { %534 = dma.done.wait [#allocation3], 1024  }
   0xb   :  { %535 = vsyncadd [#allocation3], 4294966272 }
   0xc   :  { %536 = dma.done.wait [#allocation5], 16384  }
   0xd   :  { %537 = vsyncadd [#allocation5], 4294950912  ;;  %v102_v0 = vld [vmem:[#allocation4 + $0xf8] sm:$0xff]  ;;  %v100_v2 = vld [vmem:[#allocation4 + $0xe8] sm:$0xff] }
   0xe   :  { %v134_v1 = vld [vmem:[#allocation4 + $0x1f8] sm:$0xff]  ;;  %193 = vmatpush.msra.mxu2 %v102_v0  ;;  %v132_v3 = vld [vmem:[#allocation4 + $0x1e8] sm:$0xff]  ;;  %v101_v6 = vld [vmem:[#allocation4 + $0xf0] sm:$0xff] }
   0xf   :  { %222 = vmatpush.msra.mxu3 %v134_v1  ;;  %v98_v4 = vld [vmem:[#allocation4 + $0xd8] sm:$0xff]  ;;  %v133_v7 = vld [vmem:[#allocation4 + $0x1f0] sm:$0xff]  ;;  %v99_v8 = vld [vmem:[#allocation4 + $0xe0] sm:$0xff]  ;;  %135 = vmatpush.msra.mxu0 %v101_v6 }
  0x10   :  { %v130_v5 = vld [vmem:[#allocation4 + $0x1d8] sm:$0xff]  ;;  %194 = vmatpush.msra.mxu2 %v100_v2  ;;  %v131_v9 = vld [vmem:[#allocation4 + $0x1e0] sm:$0xff]  ;;  %164 = vmatpush.msra.mxu1 %v133_v7  ;;  %v96_v10 = vld [vmem:[#allocation4 + $0xc8] sm:$0xff] }
  0x11   :  { %223 = vmatpush.msra.mxu3 %v132_v3  ;;  %v128_v11 = vld [vmem:[#allocation4 + $0x1c8] sm:$0xff]  ;;  %v97_v12 = vld [vmem:[#allocation4 + $0xd0] sm:$0xff]  ;;  %136 = vmatpush.msra.mxu0 %v99_v8  ;;  %v94_v14 = vld [vmem:[#allocation4 + $0xb8] sm:$0xff] }
  0x12   :  { %195 = vmatpush.msra.mxu2 %v98_v4  ;;  %v129_v13 = vld [vmem:[#allocation4 + $0x1d0] sm:$0xff]  ;;  %165 = vmatpush.msra.mxu1 %v131_v9  ;;  %v126_v15 = vld [vmem:[#allocation4 + $0x1b8] sm:$0xff]  ;;  %v95_v16 = vld [vmem:[#allocation4 + $0xc0] sm:$0xff] }
  0x13   :  { %224 = vmatpush.msra.mxu3 %v130_v5  ;;  %v127_v17 = vld [vmem:[#allocation4 + $0x1c0] sm:$0xff]  ;;  %137 = vmatpush.msra.mxu0 %v97_v12  ;;  %v92_v18 = vld [vmem:[#allocation4 + $0xa8] sm:$0xff]  ;;  %v93_v20 = vld [vmem:[#allocation4 + $0xb0] sm:$0xff] }
  0x14   :  { %196 = vmatpush.msra.mxu2 %v96_v10  ;;  %166 = vmatpush.msra.mxu1 %v129_v13  ;;  %v124_v19 = vld [vmem:[#allocation4 + $0x1a8] sm:$0xff]  ;;  %v125_v21 = vld [vmem:[#allocation4 + $0x1b0] sm:$0xff]  ;;  %v90_v22 = vld [vmem:[#allocation4 + $0x98] sm:$0xff] }
  0x15   :  { %225 = vmatpush.msra.mxu3 %v128_v11  ;;  %138 = vmatpush.msra.mxu0 %v95_v16  ;;  %v122_v23 = vld [vmem:[#allocation4 + $0x198] sm:$0xff]  ;;  %v91_v24 = vld [vmem:[#allocation4 + $0xa0] sm:$0xff]  ;;  %v88_v26 = vld [vmem:[#allocation4 + $0x88] sm:$0xff] }
  0x16   :  { %197 = vmatpush.msra.mxu2 %v94_v14  ;;  %167 = vmatpush.msra.mxu1 %v127_v17  ;;  %v123_v25 = vld [vmem:[#allocation4 + $0x1a0] sm:$0xff]  ;;  %v120_v27 = vld [vmem:[#allocation4 + $0x188] sm:$0xff]  ;;  %v89_v28 = vld [vmem:[#allocation4 + $0x90] sm:$0xff] }
  0x17   :  { %226 = vmatpush.msra.mxu3 %v126_v15  ;;  %139 = vmatpush.msra.mxu0 %v93_v20  ;;  %v121_v29 = vld [vmem:[#allocation4 + $0x190] sm:$0xff]  ;;  %v86_v30 = vld [vmem:[#allocation4 + $0x78] sm:$0xff]  ;;  %v87_v32 = vld [vmem:[#allocation4 + $0x80] sm:$0xff] }
  0x18   :  { %198 = vmatpush.msra.mxu2 %v92_v18  ;;  %168 = vmatpush.msra.mxu1 %v125_v21  ;;  %v118_v31 = vld [vmem:[#allocation4 + $0x178] sm:$0xff]  ;;  %v119_v33 = vld [vmem:[#allocation4 + $0x180] sm:$0xff]  ;;  %v84_v34 = vld [vmem:[#allocation4 + $0x68] sm:$0xff] }
  0x19   :  { %227 = vmatpush.msra.mxu3 %v124_v19  ;;  %140 = vmatpush.msra.mxu0 %v91_v24  ;;  %v116_v35 = vld [vmem:[#allocation4 + $0x168] sm:$0xff]  ;;  %v85_v36 = vld [vmem:[#allocation4 + $0x70] sm:$0xff]  ;;  %v82_v38 = vld [vmem:[#allocation4 + $0x58] sm:$0xff] }
  0x1a   :  { %199 = vmatpush.msra.mxu2 %v90_v22  ;;  %169 = vmatpush.msra.mxu1 %v123_v25  ;;  %v117_v37 = vld [vmem:[#allocation4 + $0x170] sm:$0xff]  ;;  %v114_v39 = vld [vmem:[#allocation4 + $0x158] sm:$0xff]  ;;  %v83_v40 = vld [vmem:[#allocation4 + $0x60] sm:$0xff] }
  0x1b   :  { %228 = vmatpush.msra.mxu3 %v122_v23  ;;  %141 = vmatpush.msra.mxu0 %v89_v28  ;;  %v115_v41 = vld [vmem:[#allocation4 + $0x160] sm:$0xff]  ;;  %v80_v42 = vld [vmem:[#allocation4 + $0x48] sm:$0xff]  ;;  %v81_v44 = vld [vmem:[#allocation4 + $0x50] sm:$0xff] }
  0x1c   :  { %200 = vmatpush.msra.mxu2 %v88_v26  ;;  %170 = vmatpush.msra.mxu1 %v121_v29  ;;  %v112_v43 = vld [vmem:[#allocation4 + $0x148] sm:$0xff]  ;;  %v113_v45 = vld [vmem:[#allocation4 + $0x150] sm:$0xff]  ;;  %v78_v46 = vld [vmem:[#allocation4 + $0x38] sm:$0xff] }
  0x1d   :  { %229 = vmatpush.msra.mxu3 %v120_v27  ;;  %142 = vmatpush.msra.mxu0 %v87_v32  ;;  %v110_v47 = vld [vmem:[#allocation4 + $0x138] sm:$0xff]  ;;  %v79_v48 = vld [vmem:[#allocation4 + $0x40] sm:$0xff]  ;;  %v76_v50 = vld [vmem:[#allocation4 + $0x28] sm:$0xff] }
  0x1e   :  { %201 = vmatpush.msra.mxu2 %v86_v30  ;;  %171 = vmatpush.msra.mxu1 %v119_v33  ;;  %v111_v49 = vld [vmem:[#allocation4 + $0x140] sm:$0xff]  ;;  %v108_v51 = vld [vmem:[#allocation4 + $0x128] sm:$0xff]  ;;  %v77_v52 = vld [vmem:[#allocation4 + $0x30] sm:$0xff] }
  0x1f   :  { %230 = vmatpush.msra.mxu3 %v118_v31  ;;  %143 = vmatpush.msra.mxu0 %v85_v36  ;;  %v109_v53 = vld [vmem:[#allocation4 + $0x130] sm:$0xff]  ;;  %v74_v54 = vld [vmem:[#allocation4 + $0x18] sm:$0xff]  ;;  %v75_v56 = vld [vmem:[#allocation4 + $0x20] sm:$0xff] }
  0x20   :  { %202 = vmatpush.msra.mxu2 %v84_v34  ;;  %172 = vmatpush.msra.mxu1 %v117_v37  ;;  %v106_v55 = vld [vmem:[#allocation4 + $0x118] sm:$0xff]  ;;  %v107_v57 = vld [vmem:[#allocation4 + $0x120] sm:$0xff]  ;;  %v72_v58 = vld [vmem:[#allocation4 + $0x8] sm:$0xff] }
  0x21   :  { %231 = vmatpush.msra.mxu3 %v116_v35  ;;  %144 = vmatpush.msra.mxu0 %v83_v40  ;;  %v104_v59 = vld [vmem:[#allocation4 + $0x108] sm:$0xff]  ;;  %v577_v60 = vld [vmem:[#allocation2] sm:$0xff]  ;;  %v290_v62 = vld [vmem:[#allocation6 + $0xf8] sm:$0xff] }
  0x22   :  { %203 = vmatpush.msra.mxu2 %v82_v38  ;;  %173 = vmatpush.msra.mxu1 %v115_v41  ;;  %v579_v61 = vld [vmem:[#allocation2 + $0x8] sm:$0xff]  ;;  %v322_v63 = vld [vmem:[#allocation6 + $0x1f8] sm:$0xff]  ;;  %v73_v0 = vld [vmem:[#allocation4 + $0x10] sm:$0xff] }
  0x23   :  { %232 = vmatpush.msra.mxu3 %v114_v39  ;;  %145 = vmatpush.msra.mxu0 %v81_v44  ;;  %v105_v1 = vld [vmem:[#allocation4 + $0x110] sm:$0xff]  ;;  %v288_v2 = vld [vmem:[#allocation6 + $0xe8] sm:$0xff]  ;;  %v71_v4 = vld [vmem:[#allocation4] sm:$0xff] }
  0x24   :  { %204 = vmatpush.msra.mxu2 %v80_v42  ;;  %174 = vmatpush.msra.mxu1 %v113_v45  ;;  %v320_v3 = vld [vmem:[#allocation6 + $0x1e8] sm:$0xff]  ;;  %v103_v5 = vld [vmem:[#allocation4 + $0x100] sm:$0xff]  ;;  %v286_v6 = vld [vmem:[#allocation6 + $0xd8] sm:$0xff] }
  0x25   :  { %233 = vmatpush.msra.mxu3 %v112_v43  ;;  %146 = vmatpush.msra.mxu0 %v79_v48  ;;  %v318_v7 = vld [vmem:[#allocation6 + $0x1d8] sm:$0xff]  ;;  %v289_v8 = vld [vmem:[#allocation6 + $0xf0] sm:$0xff]  ;;  %v284_v10 = vld [vmem:[#allocation6 + $0xc8] sm:$0xff] }
  0x26   :  { %205 = vmatpush.msra.mxu2 %v78_v46  ;;  %175 = vmatpush.msra.mxu1 %v111_v49  ;;  %v321_v9 = vld [vmem:[#allocation6 + $0x1f0] sm:$0xff]  ;;  %v316_v11 = vld [vmem:[#allocation6 + $0x1c8] sm:$0xff]  ;;  %v587_v13 = vld [vmem:[#allocation2 + $0x18] sm:$0xff] }
  0x27   :  { %234 = vmatpush.msra.mxu3 %v110_v47  ;;  %147 = vmatpush.msra.mxu0 %v77_v52  ;;  %v585_v12 = vld [vmem:[#allocation2 + $0x10] sm:$0xff]  ;;  %v287_v14 = vld [vmem:[#allocation6 + $0xe0] sm:$0xff]  ;;  %v282_v16 = vld [vmem:[#allocation6 + $0xb8] sm:$0xff] }
  0x28   :  { %206 = vmatpush.msra.mxu2 %v76_v50  ;;  %176 = vmatpush.msra.mxu1 %v109_v53  ;;  %v319_v15 = vld [vmem:[#allocation6 + $0x1e0] sm:$0xff]  ;;  %v314_v17 = vld [vmem:[#allocation6 + $0x1b8] sm:$0xff]  ;;  %v285_v18 = vld [vmem:[#allocation6 + $0xd0] sm:$0xff] }
  0x29   :  { %235 = vmatpush.msra.mxu3 %v108_v51  ;;  %148 = vmatpush.msra.mxu0 %v75_v56  ;;  %v317_v19 = vld [vmem:[#allocation6 + $0x1d0] sm:$0xff]  ;;  %v280_v20 = vld [vmem:[#allocation6 + $0xa8] sm:$0xff]  ;;  %v283_v22 = vld [vmem:[#allocation6 + $0xc0] sm:$0xff] }
  0x2a   :  { %207 = vmatpush.msra.mxu2 %v74_v54  ;;  %177 = vmatpush.msra.mxu1 %v107_v57  ;;  %v312_v21 = vld [vmem:[#allocation6 + $0x1a8] sm:$0xff]  ;;  %v315_v23 = vld [vmem:[#allocation6 + $0x1c0] sm:$0xff]  ;;  %v278_v24 = vld [vmem:[#allocation6 + $0x98] sm:$0xff] }
  0x2b   :  { %236 = vmatpush.msra.mxu3 %v106_v55  ;;  %149 = vmatpush.msra.mxu0 %v73_v0  ;;  %v310_v25 = vld [vmem:[#allocation6 + $0x198] sm:$0xff]  ;;  %v281_v26 = vld [vmem:[#allocation6 + $0xb0] sm:$0xff]  ;;  %v276_v28 = vld [vmem:[#allocation6 + $0x88] sm:$0xff] }
  0x2c   :  { %208 = vmatpush.msra.mxu2 %v72_v58  ;;  %178 = vmatpush.msra.mxu1 %v105_v1  ;;  %v313_v27 = vld [vmem:[#allocation6 + $0x1b0] sm:$0xff]  ;;  %v308_v29 = vld [vmem:[#allocation6 + $0x188] sm:$0xff]  ;;  %v593_v30 = vld [vmem:[#allocation2 + $0x20] sm:$0xff] }
  0x2d   :  { %237 = vmatpush.msra.mxu3 %v104_v59  ;;  %209 = vmatmul.f32.vlgmr.msra.gmra.mxu2 %v577_v60  ;;  %v595_v31 = vld [vmem:[#allocation2 + $0x28] sm:$0xff]  ;;  %v279_v32 = vld [vmem:[#allocation6 + $0xa0] sm:$0xff]  ;;  %v274_v34 = vld [vmem:[#allocation6 + $0x78] sm:$0xff] }
  0x2e   :  { %238 = vmatmul.f32.vlgmr.msra.gmra.mxu3 %v579_v61  ;;  %381 = vmatpush.msrb.mxu2 %v290_v62  ;;  %v311_v33 = vld [vmem:[#allocation6 + $0x1a0] sm:$0xff]  ;;  %v306_v35 = vld [vmem:[#allocation6 + $0x178] sm:$0xff]  ;;  %v277_v36 = vld [vmem:[#allocation6 + $0x90] sm:$0xff] }
  0x2f   :  { %410 = vmatpush.msrb.mxu3 %v322_v63  ;;  %150 = vmatpush.msra.mxu0 %v71_v4  ;;  %v309_v37 = vld [vmem:[#allocation6 + $0x190] sm:$0xff]  ;;  %v272_v38 = vld [vmem:[#allocation6 + $0x68] sm:$0xff]  ;;  %v275_v40 = vld [vmem:[#allocation6 + $0x80] sm:$0xff] }
  0x30   :  { %382 = vmatpush.msrb.mxu2 %v288_v2  ;;  %179 = vmatpush.msra.mxu1 %v103_v5  ;;  %v304_v39 = vld [vmem:[#allocation6 + $0x168] sm:$0xff]  ;;  %v307_v41 = vld [vmem:[#allocation6 + $0x180] sm:$0xff]  ;;  %v270_v42 = vld [vmem:[#allocation6 + $0x58] sm:$0xff] }
  0x31   :  { %411 = vmatpush.msrb.mxu3 %v320_v3  ;;  %151 = vmatmul.f32.vlgmr.msra.gmra.mxu0 %v577_v60  ;;  %v302_v43 = vld [vmem:[#allocation6 + $0x158] sm:$0xff]  ;;  %v273_v44 = vld [vmem:[#allocation6 + $0x70] sm:$0xff]  ;;  %v268_v46 = vld [vmem:[#allocation6 + $0x48] sm:$0xff] }
  0x32   :  { %383 = vmatpush.msrb.mxu2 %v286_v6  ;;  %180 = vmatmul.f32.vlgmr.msra.gmra.mxu1 %v579_v61  ;;  %v305_v45 = vld [vmem:[#allocation6 + $0x170] sm:$0xff]  ;;  %v300_v47 = vld [vmem:[#allocation6 + $0x148] sm:$0xff]  ;;  %v603_v49 = vld [vmem:[#allocation2 + $0x38] sm:$0xff] }
  0x33   :  { %412 = vmatpush.msrb.mxu3 %v318_v7  ;;  %323 = vmatpush.msrb.mxu0 %v289_v8  ;;  %v601_v48 = vld [vmem:[#allocation2 + $0x30] sm:$0xff]  ;;  %v271_v50 = vld [vmem:[#allocation6 + $0x60] sm:$0xff]  ;;  %v266_v52 = vld [vmem:[#allocation6 + $0x38] sm:$0xff] }
  0x34   :  { %352 = vmatpush.msrb.mxu1 %v321_v9  ;;  %384 = vmatpush.msrb.mxu2 %v284_v10  ;;  %v303_v51 = vld [vmem:[#allocation6 + $0x160] sm:$0xff]  ;;  %v298_v53 = vld [vmem:[#allocation6 + $0x138] sm:$0xff]  ;;  %v269_v54 = vld [vmem:[#allocation6 + $0x50] sm:$0xff] }
  0x35   :  { %413 = vmatpush.msrb.mxu3 %v316_v11  ;;  %212 = vmatmul.f32.gmra.mxu2 %v585_v12  ;;  %v301_v55 = vld [vmem:[#allocation6 + $0x150] sm:$0xff]  ;;  %v264_v56 = vld [vmem:[#allocation6 + $0x28] sm:$0xff]  ;;  %v267_v58 = vld [vmem:[#allocation6 + $0x40] sm:$0xff] }
  0x36   :  { %241 = vmatmul.f32.gmra.mxu3 %v587_v13  ;;  %324 = vmatpush.msrb.mxu0 %v287_v14  ;;  %v296_v57 = vld [vmem:[#allocation6 + $0x128] sm:$0xff]  ;;  %v299_v59 = vld [vmem:[#allocation6 + $0x140] sm:$0xff]  ;;  %v262_v62 = vld [vmem:[#allocation6 + $0x18] sm:$0xff] }
  0x37   :  { %353 = vmatpush.msrb.mxu1 %v319_v15  ;;  %385 = vmatpush.msrb.mxu2 %v282_v16  ;;  %v294_v63 = vld [vmem:[#allocation6 + $0x118] sm:$0xff]  ;;  %v265_v0 = vld [vmem:[#allocation6 + $0x30] sm:$0xff]  ;;  %v260_v2 = vld [vmem:[#allocation6 + $0x8] sm:$0xff] }
  0x38   :  { %414 = vmatpush.msrb.mxu3 %v314_v17  ;;  %325 = vmatpush.msrb.mxu0 %v285_v18  ;;  %v297_v1 = vld [vmem:[#allocation6 + $0x130] sm:$0xff]  ;;  %v292_v3 = vld [vmem:[#allocation6 + $0x108] sm:$0xff]  ;;  %v263_v4 = vld [vmem:[#allocation6 + $0x20] sm:$0xff] }
  0x39   :  { %354 = vmatpush.msrb.mxu1 %v317_v19  ;;  %386 = vmatpush.msrb.mxu2 %v280_v20  ;;  %v295_v5 = vld [vmem:[#allocation6 + $0x120] sm:$0xff]  ;;  %v261_v6 = vld [vmem:[#allocation6 + $0x10] sm:$0xff] }
  0x3a   :  { %415 = vmatpush.msrb.mxu3 %v312_v21  ;;  %326 = vmatpush.msrb.mxu0 %v283_v22  ;;  %v293_v7 = vld [vmem:[#allocation6 + $0x110] sm:$0xff]  ;;  %v259_v8 = vld [vmem:[#allocation6] sm:$0xff] }
  0x3b   :  { %355 = vmatpush.msrb.mxu1 %v315_v23  ;;  %387 = vmatpush.msrb.mxu2 %v278_v24  ;;  %v291_v9 = vld [vmem:[#allocation6 + $0x100] sm:$0xff] }
  0x3c   :  { %416 = vmatpush.msrb.mxu3 %v310_v25  ;;  %154 = vmatmul.f32.gmra.mxu0 %v585_v12 }
  0x3d   :  { %183 = vmatmul.f32.gmra.mxu1 %v587_v13  ;;  %327 = vmatpush.msrb.mxu0 %v281_v26 }
  0x3e   :  { %356 = vmatpush.msrb.mxu1 %v313_v27  ;;  %388 = vmatpush.msrb.mxu2 %v276_v28 }
  0x3f   :  { %417 = vmatpush.msrb.mxu3 %v308_v29  ;;  %215 = vmatmul.f32.gmra.mxu2 %v593_v30 }
  0x40   :  { %244 = vmatmul.f32.gmra.mxu3 %v595_v31  ;;  %328 = vmatpush.msrb.mxu0 %v279_v32 }
  0x41   :  { %357 = vmatpush.msrb.mxu1 %v311_v33  ;;  %389 = vmatpush.msrb.mxu2 %v274_v34 }
  0x42   :  { %418 = vmatpush.msrb.mxu3 %v306_v35  ;;  %329 = vmatpush.msrb.mxu0 %v277_v36 }
  0x43   :  { %358 = vmatpush.msrb.mxu1 %v309_v37  ;;  %390 = vmatpush.msrb.mxu2 %v272_v38 }
  0x44   :  { %419 = vmatpush.msrb.mxu3 %v304_v39  ;;  %330 = vmatpush.msrb.mxu0 %v275_v40 }
  0x45   :  { %359 = vmatpush.msrb.mxu1 %v307_v41  ;;  %391 = vmatpush.msrb.mxu2 %v270_v42 }
  0x46   :  { %420 = vmatpush.msrb.mxu3 %v302_v43  ;;  %157 = vmatmul.f32.gmra.mxu0 %v593_v30 }
  0x47   :  { %186 = vmatmul.f32.gmra.mxu1 %v595_v31  ;;  %331 = vmatpush.msrb.mxu0 %v273_v44 }
  0x48   :  { %360 = vmatpush.msrb.mxu1 %v305_v45  ;;  %392 = vmatpush.msrb.mxu2 %v268_v46 }
  0x49   :  { %421 = vmatpush.msrb.mxu3 %v300_v47  ;;  %218 = vmatmul.f32.gmra.mxu2 %v601_v48 }
  0x4a   :  { %247 = vmatmul.f32.gmra.mxu3 %v603_v49  ;;  %332 = vmatpush.msrb.mxu0 %v271_v50 }
  0x4b   :  { %361 = vmatpush.msrb.mxu1 %v303_v51  ;;  %393 = vmatpush.msrb.mxu2 %v266_v52 }
  0x4c   :  { %422 = vmatpush.msrb.mxu3 %v298_v53  ;;  %333 = vmatpush.msrb.mxu0 %v269_v54 }
  0x4d   :  { %362 = vmatpush.msrb.mxu1 %v301_v55  ;;  %394 = vmatpush.msrb.mxu2 %v264_v56 }
  0x4e   :  { %423 = vmatpush.msrb.mxu3 %v296_v57  ;;  %334 = vmatpush.msrb.mxu0 %v267_v58 }
  0x4f   :  { %363 = vmatpush.msrb.mxu1 %v299_v59  ;;  %395 = vmatpush.msrb.mxu2 %v262_v62 }
  0x50   :  { %424 = vmatpush.msrb.mxu3 %v294_v63  ;;  %160 = vmatmul.f32.gmra.mxu0 %v601_v48 }
  0x51   :  { %189 = vmatmul.f32.gmra.mxu1 %v603_v49  ;;  %335 = vmatpush.msrb.mxu0 %v265_v0 }
  0x52   :  { %364 = vmatpush.msrb.mxu1 %v297_v1  ;;  %396 = vmatpush.msrb.mxu2 %v260_v2 }
  0x53   :  { %425 = vmatpush.msrb.mxu3 %v292_v3  ;;  %336 = vmatpush.msrb.mxu0 %v263_v4 }
  0x54   :  { %365 = vmatpush.msrb.mxu1 %v295_v5  ;;  %397 = vmatmul.f32.vlgmr.msrb.gmra.mxu2 %v577_v60 }
  0x55   :  { %426 = vmatmul.f32.vlgmr.msrb.gmra.mxu3 %v579_v61  ;;  %337 = vmatpush.msrb.mxu0 %v261_v6 }
  0x56   :  { %366 = vmatpush.msrb.mxu1 %v293_v7 }
  0x57   :  { %338 = vmatpush.msrb.mxu0 %v259_v8 }
  0x58   :  { %367 = vmatpush.msrb.mxu1 %v291_v9  ;;  %339 = vmatmul.f32.vlgmr.msrb.gmra.mxu0 %v577_v60 }
  0x59   :  { %368 = vmatmul.f32.vlgmr.msrb.gmra.mxu1 %v579_v61 }
  0x5c   :  { %400 = vmatmul.f32.gmra.mxu2 %v585_v12 }
  0x5d   :  { %429 = vmatmul.f32.gmra.mxu3 %v587_v13 }
  0x60   :  { %342 = vmatmul.f32.gmra.mxu0 %v585_v12 }
  0x61   :  { %371 = vmatmul.f32.gmra.mxu1 %v587_v13 }
  0x64   :  { %403 = vmatmul.f32.gmra.mxu2 %v593_v30 }
  0x65   :  { %432 = vmatmul.f32.gmra.mxu3 %v595_v31 }
  0x68   :  { %345 = vmatmul.f32.gmra.mxu0 %v593_v30 }
  0x69   :  { %374 = vmatmul.f32.gmra.mxu1 %v595_v31 }
  0x6c   :  { %406 = vmatmul.f32.gmra.mxu2 %v601_v48 }
  0x6d   :  { %435 = vmatmul.f32.gmra.mxu3 %v603_v49 }
  0x70   :  { %348 = vmatmul.f32.gmra.mxu0 %v601_v48 }
  0x71   :  { %377 = vmatmul.f32.gmra.mxu1 %v603_v49 }
  0xae   :  { %v152_v60 = vpop.f32.mrf.mxu0 }
  0xaf   :  { %v181_v61 = vpop.f32.mrf.mxu1 }
  0xb0   :  { %v182_v10 = vadd.f32 %v181_v61, %v152_v60  ;;  %v210_v11 = vpop.f32.mrf.mxu2 }
  0xb1   :  { %v239_v12 = vpop.f32.mrf.mxu3 }
  0xb2   :  { %v240_v13 = vadd.f32 %v239_v12, %v210_v11  ;;  %251 = vst [vmem:[%s676_s3] sm:$0xff] %v182_v10 }
  0xb4   :  { %252 = vst [vmem:[%s676_s3 + $0x8] sm:$0xff] %v240_v13 }
  0xb8   :  { %v213_v14 = vpop.f32.mrf.mxu2 }
  0xb9   :  { %v242_v15 = vpop.f32.mrf.mxu3  ;;  %v155_v16 = vpop.f32.mrf.mxu0 }
  0xba   :  { %v184_v17 = vpop.f32.mrf.mxu1  ;;  %v243_v18 = vadd.f32 %v242_v15, %v213_v14 }
  0xbb   :  { %v185_v19 = vadd.f32 %v184_v17, %v155_v16 }
  0xbc   :  { %254 = vst [vmem:[%s676_s3 + $0x18] sm:$0xff] %v243_v18 }
  0xbd   :  { %253 = vst [vmem:[%s676_s3 + $0x10] sm:$0xff] %v185_v19 }
  0xc2   :  { %v216_v20 = vpop.f32.mrf.mxu2 }
  0xc3   :  { %v245_v21 = vpop.f32.mrf.mxu3  ;;  %v158_v22 = vpop.f32.mrf.mxu0 }
  0xc4   :  { %v187_v23 = vpop.f32.mrf.mxu1  ;;  %v246_v24 = vadd.f32 %v245_v21, %v216_v20 }
  0xc5   :  { %v188_v25 = vadd.f32 %v187_v23, %v158_v22 }
  0xc6   :  { %256 = vst [vmem:[%s676_s3 + $0x28] sm:$0xff] %v246_v24 }
  0xc7   :  { %255 = vst [vmem:[%s676_s3 + $0x20] sm:$0xff] %v188_v25 }
  0xcc   :  { %v219_v26 = vpop.f32.mrf.mxu2 }
  0xcd   :  { %v248_v27 = vpop.f32.mrf.mxu3  ;;  %v161_v28 = vpop.f32.mrf.mxu0 }
  0xce   :  { %v190_v29 = vpop.f32.mrf.mxu1  ;;  %v249_v30 = vadd.f32 %v248_v27, %v219_v26 }
  0xcf   :  { %v191_v31 = vadd.f32 %v190_v29, %v161_v28 }
  0xd0   :  { %258 = vst [vmem:[%s676_s3 + $0x38] sm:$0xff] %v249_v30 }
  0xd1   :  { %257 = vst [vmem:[%s676_s3 + $0x30] sm:$0xff] %v191_v31 }
  0xd5   :  { %v340_v32 = vpop.f32.mrf.mxu0 }
  0xd6   :  { %v369_v33 = vpop.f32.mrf.mxu1 }
  0xd7   :  { %v370_v34 = vadd.f32 %v369_v33, %v340_v32  ;;  %v398_v35 = vpop.f32.mrf.mxu2 }
  0xd8   :  { %v427_v36 = vpop.f32.mrf.mxu3 }
  0xd9   :  { %439 = vst [vmem:[%s677_s4] sm:$0xff] %v370_v34  ;;  %v428_v37 = vadd.f32 %v427_v36, %v398_v35 }
  0xdb   :  { %440 = vst [vmem:[%s677_s4 + $0x8] sm:$0xff] %v428_v37 }
  0xdd   :  { %v343_v38 = vpop.f32.mrf.mxu0 }
  0xde   :  { %v372_v39 = vpop.f32.mrf.mxu1 }
  0xdf   :  { %v373_v40 = vadd.f32 %v372_v39, %v343_v38  ;;  %v401_v41 = vpop.f32.mrf.mxu2 }
  0xe0   :  { %v430_v42 = vpop.f32.mrf.mxu3 }
  0xe1   :  { %441 = vst [vmem:[%s677_s4 + $0x10] sm:$0xff] %v373_v40  ;;  %v431_v43 = vadd.f32 %v430_v42, %v401_v41 }
  0xe3   :  { %442 = vst [vmem:[%s677_s4 + $0x18] sm:$0xff] %v431_v43 }
  0xe5   :  { %v346_v44 = vpop.f32.mrf.mxu0 }
  0xe6   :  { %v375_v45 = vpop.f32.mrf.mxu1 }
  0xe7   :  { %v376_v46 = vadd.f32 %v375_v45, %v346_v44  ;;  %v404_v47 = vpop.f32.mrf.mxu2 }
  0xe8   :  { %v433_v48 = vpop.f32.mrf.mxu3 }
  0xe9   :  { %443 = vst [vmem:[%s677_s4 + $0x20] sm:$0xff] %v376_v46  ;;  %v434_v49 = vadd.f32 %v433_v48, %v404_v47 }
  0xeb   :  { %444 = vst [vmem:[%s677_s4 + $0x28] sm:$0xff] %v434_v49 }
  0xed   :  { %v349_v50 = vpop.f32.mrf.mxu0 }
  0xee   :  { %v378_v51 = vpop.f32.mrf.mxu1 }
  0xef   :  { %v379_v52 = vadd.f32 %v378_v51, %v349_v50  ;;  %v407_v53 = vpop.f32.mrf.mxu2 }
  0xf0   :  { %v436_v54 = vpop.f32.mrf.mxu3 }
  0xf1   :  { %445 = vst [vmem:[%s677_s4 + $0x30] sm:$0xff] %v379_v52  ;;  %v437_v55 = vadd.f32 %v436_v54, %v407_v53 }
  0xf3   :  { %446 = vst [vmem:[%s677_s4 + $0x38] sm:$0xff] %v437_v55 }
  0xf4   :  { %455 = vsyncpa [#allocation3], 1 }
  0xf5   :  { %456 = vsyncpa [#allocation5], 1 }

</bundles_post_ra>
